<compile_context>
chip_gen: v6e
topology: v6e:2x2x1
jax: 0.10.0
libtpu: 0.0.40
codegen_flags: <defaults>
</compile_context>

<pallas_src>
import jax
import jax.numpy as jnp
from jax.experimental import pallas as pl
from jax.experimental.pallas import tpu as pltpu

# ----------------------------- config (small synthetic) -----------------------------
BATCH = 2
SEQ = 8
HIDDEN = 128          # roberta-large uses 1024; scaled down for the synthetic test
N_HEADS = 2
HEAD_DIM = HIDDEN // N_HEADS
INTER = 4 * HIDDEN
N_LAYERS = 2
VOCAB = 100
MAX_POS = 64
PAD_IDX = 1           # RoBERTa padding_idx
NUM_CLASSES = 1
LN_EPS = 1e-5


# ----------------------------- fused encoder kernel ---------------------------------
def _encoder_kernel(emb_ref, bias_ref, eg_ref, eb_ref,
                    wqkv_ref, bqkv_ref, wo_ref, bo_ref, ln1g_ref, ln1b_ref,
                    wi_ref, bi_ref, wo2_ref, bo2_ref, ln2g_ref, ln2b_ref,
                    poolw_ref, poolb_ref, outw_ref, outb_ref,
                    logits_ref, x_scr):
    """Grid = (batch, layer).  One full encoder layer per step; pooler+classifier fused
    into the last layer step.  Activations live in x_scr (VMEM) across layer steps."""
    layer = pl.program_id(1)
    n_layers = pl.num_programs(1)
    scale = 1.0 / (HEAD_DIM ** 0.5)

    def layernorm(t, g, b):
        mu = jnp.mean(t, axis=-1, keepdims=True)
        tc = t - mu
        var = jnp.mean(tc * tc, axis=-1, keepdims=True)
        return tc * jax.lax.rsqrt(var + LN_EPS) * g + b

    # --- embedding LayerNorm (residual-free), only at the first layer step ---
    @pl.when(layer == 0)
    def _():
        e = emb_ref[0].astype(jnp.float32)                          # (S, H)
        x_scr[...] = layernorm(e, eg_ref[...], eb_ref[...])

    x = x_scr[...]                                                  # (S, H) f32
    xb = x.astype(jnp.bfloat16)
    bias = bias_ref[0]                                              # (1, S) additive mask

    # --- fused QKV projection: one (S,H)@(H,3H) bf16 MXU matmul, f32 accumulation ---
    qkv = jnp.dot(xb, wqkv_ref[0], preferred_element_type=jnp.float32) + bqkv_ref[0]

    # --- multi-head self-attention; heads stay packed along the 128-lane axis ---
    ctx_heads = []
    for h in range(N_HEADS):                                        # static unroll
        lo = h * HEAD_DIM
        q = qkv[:, lo:lo + HEAD_DIM]                                # (S, Dh)
        k = qkv[:, HIDDEN + lo:HIDDEN + lo + HEAD_DIM]              # (S, Dh)
        v = qkv[:, 2 * HIDDEN + lo:2 * HIDDEN + lo + HEAD_DIM]      # (S, Dh)
        s = jax.lax.dot_general(q, k, (((1,), (1,)), ((), ())),
                                preferred_element_type=jnp.float32) * scale + bias
        s = s - jnp.max(s, axis=-1, keepdims=True)
        p = jnp.exp(s)
        p = p * pl.reciprocal(jnp.sum(p, axis=-1, keepdims=True), approx=True)
        ctx_heads.append(jnp.dot(p, v, preferred_element_type=jnp.float32))
    ctx = jnp.concatenate(ctx_heads, axis=-1)                       # (S, H) lane-dense

    # --- attention output projection + residual LN ---
    attn_out = jnp.dot(ctx.astype(jnp.bfloat16), wo_ref[0],
                       preferred_element_type=jnp.float32) + bo_ref[0]
    x = layernorm(attn_out + x, ln1g_ref[0], ln1b_ref[0])

    # --- feed-forward (GELU, tanh approximation) + residual LN ---
    hmid = jnp.dot(x.astype(jnp.bfloat16), wi_ref[0],
                   preferred_element_type=jnp.float32) + bi_ref[0]
    hmid = 0.5 * hmid * (1.0 + jnp.tanh(
        0.7978845608028654 * (hmid + 0.044715 * hmid * hmid * hmid)))
    ff = jnp.dot(hmid.astype(jnp.bfloat16), wo2_ref[0],
                 preferred_element_type=jnp.float32) + bo2_ref[0]
    x = layernorm(ff + x, ln2g_ref[0], ln2b_ref[0])
    x_scr[...] = x

    # --- pooler (tanh on [CLS]) + dropout(eval=id) + classifier, fused at last layer ---
    @pl.when(layer == n_layers - 1)
    def _():
        cls = x[0:1, :]                                             # (1, H)
        pooled = jnp.tanh(jnp.dot(cls.astype(jnp.bfloat16), poolw_ref[...],
                                  preferred_element_type=jnp.float32) + poolb_ref[...])
        # TODO(synk): training-mode stochastic dropout (p=0.2) not applied (inference).
        logits = jnp.dot(pooled, outw_ref[...],
                         preferred_element_type=jnp.float32) + outb_ref[...]
        logits_ref[0] = logits.astype(logits_ref.dtype)


# ----------------------------- parameter init ---------------------------------------
def init_params(key):
    keys = iter(jax.random.split(key, 16))

    def nrm(shape, dtype=jnp.float32):
        return (0.02 * jax.random.normal(next(keys), shape)).astype(dtype)

    L, H, I = N_LAYERS, HIDDEN, INTER
    return {
        "word_emb": nrm((VOCAB, H)),
        "pos_emb": nrm((MAX_POS, H)),
        "type_emb": nrm((2, H)),
        "emb_ln_g": jnp.ones((1, H), jnp.float32),
        "emb_ln_b": jnp.zeros((1, H), jnp.float32),
        # fused QKV weight: [L, H, 3H] = [q | k | v] along output axis; bf16 for the MXU
        "wqkv": nrm((L, H, 3 * H), jnp.bfloat16),
        "bqkv": jnp.zeros((L, 1, 3 * H), jnp.float32),
        "wo":   nrm((L, H, H), jnp.bfloat16),
        "bo":   jnp.zeros((L, 1, H), jnp.float32),
        "ln1_g": jnp.ones((L, 1, H), jnp.float32),
        "ln1_b": jnp.zeros((L, 1, H), jnp.float32),
        "wi":   nrm((L, H, I), jnp.bfloat16),
        "bi":   jnp.zeros((L, 1, I), jnp.float32),
        "wo2":  nrm((L, I, H), jnp.bfloat16),
        "bo2":  jnp.zeros((L, 1, H), jnp.float32),
        "ln2_g": jnp.ones((L, 1, H), jnp.float32),
        "ln2_b": jnp.zeros((L, 1, H), jnp.float32),
        "pool_w": nrm((H, H), jnp.bfloat16),
        "pool_b": jnp.zeros((1, H), jnp.float32),
        "out_w": nrm((H, NUM_CLASSES), jnp.float32),
        "out_b": jnp.zeros((1, NUM_CLASSES), jnp.float32),
    }


# ----------------------------- forward pass ------------------------------------------
@jax.jit
def toxic_model_forward(params, toxic_ids, toxic_mask):
    B, S = toxic_ids.shape
    mask_f = toxic_mask.astype(jnp.float32)

    # RoBERTa position ids: cumsum of the mask offset by padding_idx.
    # NOTE: jnp.take clips out-of-range indices silently; keep S + PAD_IDX + 1 <= MAX_POS.
    pos_ids = (jnp.cumsum(toxic_mask, axis=1) * toxic_mask + PAD_IDX).astype(jnp.int32)
    # Embedding gathers are plain-JAX glue; everything downstream is one Pallas kernel.
    emb = (jnp.take(params["word_emb"], toxic_ids, axis=0)
           + jnp.take(params["pos_emb"], pos_ids, axis=0)
           + params["type_emb"][0][None, None, :])                  # [B, S, H] f32
    bias = ((1.0 - mask_f) * -1e9)[:, None, :]                      # [B, 1, S] additive bias

    batch3 = lambda b, l: (b, 0, 0)
    layer3 = lambda b, l: (l, 0, 0)
    const2 = lambda b, l: (0, 0)

    logits = pl.pallas_call(
        _encoder_kernel,
        out_shape=jax.ShapeDtypeStruct((B, 1, NUM_CLASSES), jnp.float32),
        grid=(B, N_LAYERS),
        in_specs=[
            pl.BlockSpec((1, S, HIDDEN), batch3),               # emb
            pl.BlockSpec((1, 1, S), batch3),                    # attention mask bias
            pl.BlockSpec((1, HIDDEN), const2),                  # emb_ln_g
            pl.BlockSpec((1, HIDDEN), const2),                  # emb_ln_b
            pl.BlockSpec((1, HIDDEN, 3 * HIDDEN), layer3),      # wqkv (fused)
            pl.BlockSpec((1, 1, 3 * HIDDEN), layer3),           # bqkv
            pl.BlockSpec((1, HIDDEN, HIDDEN), layer3),          # wo
            pl.BlockSpec((1, 1, HIDDEN), layer3),               # bo
            pl.BlockSpec((1, 1, HIDDEN), layer3),               # ln1_g
            pl.BlockSpec((1, 1, HIDDEN), layer3),               # ln1_b
            pl.BlockSpec((1, HIDDEN, INTER), layer3),           # wi
            pl.BlockSpec((1, 1, INTER), layer3),                # bi
            pl.BlockSpec((1, INTER, HIDDEN), layer3),           # wo2
            pl.BlockSpec((1, 1, HIDDEN), layer3),               # bo2
            pl.BlockSpec((1, 1, HIDDEN), layer3),               # ln2_g
            pl.BlockSpec((1, 1, HIDDEN), layer3),               # ln2_b
            pl.BlockSpec((HIDDEN, HIDDEN), const2),             # pool_w
            pl.BlockSpec((1, HIDDEN), const2),                  # pool_b
            pl.BlockSpec((HIDDEN, NUM_CLASSES), const2),        # out_w
            pl.BlockSpec((1, NUM_CLASSES), const2),             # out_b
        ],
        out_specs=pl.BlockSpec((1, 1, NUM_CLASSES), batch3),
        scratch_shapes=[pltpu.VMEM((S, HIDDEN), jnp.float32)],  # resident activations
        compiler_params=pltpu.CompilerParams(
            dimension_semantics=("parallel", "arbitrary")),
    )(emb, bias, params["emb_ln_g"], params["emb_ln_b"],
      params["wqkv"], params["bqkv"], params["wo"], params["bo"],
      params["ln1_g"], params["ln1_b"],
      params["wi"], params["bi"], params["wo2"], params["bo2"],
      params["ln2_g"], params["ln2_b"],
      params["pool_w"], params["pool_b"], params["out_w"], params["out_b"])

    return logits.reshape(B, NUM_CLASSES)


# ----------------------------- main ---------------------------------------------------
if __name__ == "__main__":
    key = jax.random.PRNGKey(0)
    pkey, ikey = jax.random.split(key)
    params = init_params(pkey)

    toxic_ids = jax.random.randint(ikey, (BATCH, SEQ), 2, VOCAB, dtype=jnp.int32)
    toxic_mask = jnp.ones((BATCH, SEQ), dtype=jnp.int32)

    logits = toxic_model_forward(params, toxic_ids, toxic_mask)
    logits = jax.block_until_ready(logits)
    assert logits.shape == (BATCH, NUM_CLASSES)
    assert bool(jnp.all(jnp.isfinite(logits)))
    print("KERNEL_OK")
</pallas_src>

<mosaic_0001>
module attributes {stable_mosaic.version = 11 : i64} {
  func.func @_encoder_kernel(%arg0: i32, %arg1: i32, %arg2: memref<1x8x128xf32, #tpu.memory_space<vmem>>, %arg3: memref<1x1x8xf32, #tpu.memory_space<vmem>>, %arg4: memref<1x128xf32, #tpu.memory_space<vmem>>, %arg5: memref<1x128xf32, #tpu.memory_space<vmem>>, %arg6: memref<1x128x384xbf16, #tpu.memory_space<vmem>>, %arg7: memref<1x1x384xf32, #tpu.memory_space<vmem>>, %arg8: memref<1x128x128xbf16, #tpu.memory_space<vmem>>, %arg9: memref<1x1x128xf32, #tpu.memory_space<vmem>>, %arg10: memref<1x1x128xf32, #tpu.memory_space<vmem>>, %arg11: memref<1x1x128xf32, #tpu.memory_space<vmem>>, %arg12: memref<1x128x512xbf16, #tpu.memory_space<vmem>>, %arg13: memref<1x1x512xf32, #tpu.memory_space<vmem>>, %arg14: memref<1x512x128xbf16, #tpu.memory_space<vmem>>, %arg15: memref<1x1x128xf32, #tpu.memory_space<vmem>>, %arg16: memref<1x1x128xf32, #tpu.memory_space<vmem>>, %arg17: memref<1x1x128xf32, #tpu.memory_space<vmem>>, %arg18: memref<128x128xbf16, #tpu.memory_space<vmem>>, %arg19: memref<1x128xf32, #tpu.memory_space<vmem>>, %arg20: memref<128x1xf32, #tpu.memory_space<vmem>>, %arg21: memref<1x1xf32, #tpu.memory_space<vmem>>, %arg22: memref<1x1x1xf32, #tpu.memory_space<vmem>>, %arg23: memref<8x128xf32, #tpu.memory_space<vmem>>) attributes {dimension_semantics = [#tpu.dimension_semantics<parallel>, #tpu.dimension_semantics<arbitrary>], iteration_bounds = array<i64: 2, 2>, scalar_prefetch = 0 : i64, scratch_operands = 1 : i64, tpu.core_type = #tpu.core_type<tc>, window_params = [{transform_indices = @transform_0, window_bounds = array<i64: 1, 8, 128>}, {transform_indices = @transform_1, window_bounds = array<i64: 1, 1, 8>}, {pipeline_mode = #tpu.pipeline_mode<synchronous>, transform_indices = @transform_2, window_bounds = array<i64: 1, 128>}, {pipeline_mode = #tpu.pipeline_mode<synchronous>, transform_indices = @transform_3, window_bounds = array<i64: 1, 128>}, {transform_indices = @transform_4, window_bounds = array<i64: 1, 128, 384>}, {transform_indices = @transform_5, window_bounds = array<i64: 1, 1, 384>}, {transform_indices = @transform_6, window_bounds = array<i64: 1, 128, 128>}, {transform_indices = @transform_7, window_bounds = array<i64: 1, 1, 128>}, {transform_indices = @transform_8, window_bounds = array<i64: 1, 1, 128>}, {transform_indices = @transform_9, window_bounds = array<i64: 1, 1, 128>}, {transform_indices = @transform_10, window_bounds = array<i64: 1, 128, 512>}, {transform_indices = @transform_11, window_bounds = array<i64: 1, 1, 512>}, {transform_indices = @transform_12, window_bounds = array<i64: 1, 512, 128>}, {transform_indices = @transform_13, window_bounds = array<i64: 1, 1, 128>}, {transform_indices = @transform_14, window_bounds = array<i64: 1, 1, 128>}, {transform_indices = @transform_15, window_bounds = array<i64: 1, 1, 128>}, {pipeline_mode = #tpu.pipeline_mode<synchronous>, transform_indices = @transform_16, window_bounds = array<i64: 128, 128>}, {pipeline_mode = #tpu.pipeline_mode<synchronous>, transform_indices = @transform_17, window_bounds = array<i64: 1, 128>}, {pipeline_mode = #tpu.pipeline_mode<synchronous>, transform_indices = @transform_18, window_bounds = array<i64: 128, 1>}, {pipeline_mode = #tpu.pipeline_mode<synchronous>, transform_indices = @transform_19, window_bounds = array<i64: 1, 1>}, {transform_indices = @transform_20, window_bounds = array<i64: 1, 1, 1>}]} {
    %c0_i32 = arith.constant 0 : i32
    %0 = arith.cmpi eq, %arg1, %c0_i32 : i32
    %1 = arith.extui %0 : i1 to i32
    %c0_i32_0 = arith.constant 0 : i32
    %2 = arith.cmpi ne, %1, %c0_i32_0 : i32
    scf.if %2 {
      %c0_71 = arith.constant 0 : index
      %c0_72 = arith.constant 0 : index
      %c0_73 = arith.constant 0 : index
      %144 = vector.load %arg2[%c0_71, %c0_72, %c0_73] : memref<1x8x128xf32, #tpu.memory_space<vmem>>, vector<1x8x128xf32>
      %145 = vector.shape_cast %144 : vector<1x8x128xf32> to vector<8x128xf32>
      %c0_74 = arith.constant 0 : index
      %c0_75 = arith.constant 0 : index
      %146 = vector.load %arg4[%c0_74, %c0_75] : memref<1x128xf32, #tpu.memory_space<vmem>>, vector<1x128xf32>
      %c0_76 = arith.constant 0 : index
      %c0_77 = arith.constant 0 : index
      %147 = vector.load %arg5[%c0_76, %c0_77] : memref<1x128xf32, #tpu.memory_space<vmem>>, vector<1x128xf32>
      %cst_78 = arith.constant dense<0.000000e+00> : vector<8xf32>
      %148 = vector.multi_reduction <add>, %145, %cst_78 [1] : vector<8x128xf32> to vector<8xf32>
      %149 = vector.shape_cast %148 : vector<8xf32> to vector<8x1xf32>
      %cst_79 = arith.constant 1.280000e+02 : f32
      %150 = vector.broadcast %cst_79 : f32 to vector<8x1xf32>
      %151 = arith.divf %149, %150 : vector<8x1xf32>
      %152 = vector.broadcast %151 : vector<8x1xf32> to vector<8x128xf32>
      %153 = arith.subf %145, %152 : vector<8x128xf32>
      %154 = arith.mulf %153, %153 : vector<8x128xf32>
      %cst_80 = arith.constant dense<0.000000e+00> : vector<8xf32>
      %155 = vector.multi_reduction <add>, %154, %cst_80 [1] : vector<8x128xf32> to vector<8xf32>
      %156 = vector.shape_cast %155 : vector<8xf32> to vector<8x1xf32>
      %cst_81 = arith.constant 1.280000e+02 : f32
      %157 = vector.broadcast %cst_81 : f32 to vector<8x1xf32>
      %158 = arith.divf %156, %157 : vector<8x1xf32>
      %cst_82 = arith.constant 9.99999974E-6 : f32
      %159 = vector.broadcast %cst_82 : f32 to vector<8x1xf32>
      %160 = arith.addf %158, %159 : vector<8x1xf32>
      %161 = math.rsqrt %160 : vector<8x1xf32>
      %162 = vector.broadcast %161 : vector<8x1xf32> to vector<8x128xf32>
      %163 = arith.mulf %153, %162 : vector<8x128xf32>
      %164 = vector.broadcast %146 : vector<1x128xf32> to vector<8x128xf32>
      %165 = arith.mulf %163, %164 : vector<8x128xf32>
      %166 = vector.broadcast %147 : vector<1x128xf32> to vector<8x128xf32>
      %167 = arith.addf %165, %166 : vector<8x128xf32>
      %c0_83 = arith.constant 0 : index
      %c0_84 = arith.constant 0 : index
      %168 = vector.load %arg23[%c0_83, %c0_84] : memref<8x128xf32, #tpu.memory_space<vmem>>, vector<8x128xf32>
      tpu.vector_store %arg23[%c0_83, %c0_84], %167 {strides = array<i32>} : memref<8x128xf32, #tpu.memory_space<vmem>>, vector<8x128xf32>,
    } else {
    }
    %c0 = arith.constant 0 : index
    %c0_1 = arith.constant 0 : index
    %3 = vector.load %arg23[%c0, %c0_1] : memref<8x128xf32, #tpu.memory_space<vmem>>, vector<8x128xf32>
    %4 = arith.truncf %3 : vector<8x128xf32> to vector<8x128xbf16>
    %c0_2 = arith.constant 0 : index
    %c0_3 = arith.constant 0 : index
    %c0_4 = arith.constant 0 : index
    %5 = vector.load %arg3[%c0_2, %c0_3, %c0_4] : memref<1x1x8xf32, #tpu.memory_space<vmem>>, vector<1x1x8xf32>
    %6 = vector.shape_cast %5 : vector<1x1x8xf32> to vector<1x8xf32>
    %c0_5 = arith.constant 0 : index
    %c0_6 = arith.constant 0 : index
    %c0_7 = arith.constant 0 : index
    %7 = vector.load %arg6[%c0_5, %c0_6, %c0_7] : memref<1x128x384xbf16, #tpu.memory_space<vmem>>, vector<1x128x384xbf16>
    %8 = vector.shape_cast %7 : vector<1x128x384xbf16> to vector<128x384xbf16>
    %cst = arith.constant dense<0.000000e+00> : vector<8x384xf32>
    %9 = tpu.matmul %4, %8, %cst {dimension_numbers = #tpu.dot_dimension_numbers<[1], [0], [0], [1], [0, 0, 1, 1], [], []>} : vector<8x128xbf16>, vector<128x384xbf16>, vector<8x384xf32> -> vector<8x384xf32>
    %c0_8 = arith.constant 0 : index
    %c0_9 = arith.constant 0 : index
    %c0_10 = arith.constant 0 : index
    %10 = vector.load %arg7[%c0_8, %c0_9, %c0_10] : memref<1x1x384xf32, #tpu.memory_space<vmem>>, vector<1x1x384xf32>
    %11 = vector.shape_cast %10 : vector<1x1x384xf32> to vector<1x384xf32>
    %12 = vector.broadcast %11 : vector<1x384xf32> to vector<8x384xf32>
    %13 = arith.addf %9, %12 : vector<8x384xf32>
    %14 = vector.extract_strided_slice %13 {offsets = [0, 0], sizes = [8, 64], strides = [1, 1]} : vector<8x384xf32> to vector<8x64xf32>
    %15 = vector.extract_strided_slice %13 {offsets = [0, 128], sizes = [8, 64], strides = [1, 1]} : vector<8x384xf32> to vector<8x64xf32>
    %16 = vector.extract_strided_slice %13 {offsets = [0, 256], sizes = [8, 64], strides = [1, 1]} : vector<8x384xf32> to vector<8x64xf32>
    %cst_11 = arith.constant dense<0.000000e+00> : vector<8x8xf32>
    %17 = tpu.matmul %14, %15, %cst_11 {dimension_numbers = #tpu.dot_dimension_numbers<[1], [1], [0], [0], [0, 0, 1, 0], [], []>} : vector<8x64xf32>, vector<8x64xf32>, vector<8x8xf32> -> vector<8x8xf32>
    %cst_12 = arith.constant 1.250000e-01 : f32
    %18 = vector.broadcast %cst_12 : f32 to vector<8x8xf32>
    %19 = arith.mulf %17, %18 : vector<8x8xf32>
    %20 = vector.broadcast %6 : vector<1x8xf32> to vector<8x8xf32>
    %21 = arith.addf %19, %20 : vector<8x8xf32>
    %cst_13 = arith.constant dense<0xFF800000> : vector<8xf32>
    %22 = vector.multi_reduction <maximumf>, %21, %cst_13 [1] : vector<8x8xf32> to vector<8xf32>
    %23 = vector.shape_cast %22 : vector<8xf32> to vector<8x1xf32>
    %24 = vector.broadcast %23 : vector<8x1xf32> to vector<8x8xf32>
    %25 = arith.subf %21, %24 : vector<8x8xf32>
    %26 = math.exp %25 : vector<8x8xf32>
    %cst_14 = arith.constant dense<0.000000e+00> : vector<8xf32>
    %27 = vector.multi_reduction <add>, %26, %cst_14 [1] : vector<8x8xf32> to vector<8xf32>
    %28 = vector.shape_cast %27 : vector<8xf32> to vector<8x1xf32>
    %29 = tpu.reciprocal %28 {approx = true} : vector<8x1xf32> -> vector<8x1xf32>
    %30 = vector.broadcast %29 : vector<8x1xf32> to vector<8x8xf32>
    %31 = arith.mulf %26, %30 : vector<8x8xf32>
    %cst_15 = arith.constant dense<0.000000e+00> : vector<8x64xf32>
    %32 = tpu.matmul %31, %16, %cst_15 {dimension_numbers = #tpu.dot_dimension_numbers<[1], [0], [0], [1], [0, 0, 1, 1], [], []>} : vector<8x8xf32>, vector<8x64xf32>, vector<8x64xf32> -> vector<8x64xf32>
    %33 = vector.extract_strided_slice %13 {offsets = [0, 64], sizes = [8, 64], strides = [1, 1]} : vector<8x384xf32> to vector<8x64xf32>
    %34 = vector.extract_strided_slice %13 {offsets = [0, 192], sizes = [8, 64], strides = [1, 1]} : vector<8x384xf32> to vector<8x64xf32>
    %35 = vector.extract_strided_slice %13 {offsets = [0, 320], sizes = [8, 64], strides = [1, 1]} : vector<8x384xf32> to vector<8x64xf32>
    %cst_16 = arith.constant dense<0.000000e+00> : vector<8x8xf32>
    %36 = tpu.matmul %33, %34, %cst_16 {dimension_numbers = #tpu.dot_dimension_numbers<[1], [1], [0], [0], [0, 0, 1, 0], [], []>} : vector<8x64xf32>, vector<8x64xf32>, vector<8x8xf32> -> vector<8x8xf32>
    %cst_17 = arith.constant 1.250000e-01 : f32
    %37 = vector.broadcast %cst_17 : f32 to vector<8x8xf32>
    %38 = arith.mulf %36, %37 : vector<8x8xf32>
    %39 = vector.broadcast %6 : vector<1x8xf32> to vector<8x8xf32>
    %40 = arith.addf %38, %39 : vector<8x8xf32>
    %cst_18 = arith.constant dense<0xFF800000> : vector<8xf32>
    %41 = vector.multi_reduction <maximumf>, %40, %cst_18 [1] : vector<8x8xf32> to vector<8xf32>
    %42 = vector.shape_cast %41 : vector<8xf32> to vector<8x1xf32>
    %43 = vector.broadcast %42 : vector<8x1xf32> to vector<8x8xf32>
    %44 = arith.subf %40, %43 : vector<8x8xf32>
    %45 = math.exp %44 : vector<8x8xf32>
    %cst_19 = arith.constant dense<0.000000e+00> : vector<8xf32>
    %46 = vector.multi_reduction <add>, %45, %cst_19 [1] : vector<8x8xf32> to vector<8xf32>
    %47 = vector.shape_cast %46 : vector<8xf32> to vector<8x1xf32>
    %48 = tpu.reciprocal %47 {approx = true} : vector<8x1xf32> -> vector<8x1xf32>
    %49 = vector.broadcast %48 : vector<8x1xf32> to vector<8x8xf32>
    %50 = arith.mulf %45, %49 : vector<8x8xf32>
    %cst_20 = arith.constant dense<0.000000e+00> : vector<8x64xf32>
    %51 = tpu.matmul %50, %35, %cst_20 {dimension_numbers = #tpu.dot_dimension_numbers<[1], [0], [0], [1], [0, 0, 1, 1], [], []>} : vector<8x8xf32>, vector<8x64xf32>, vector<8x64xf32> -> vector<8x64xf32>
    %52 = tpu.concatenate %32, %51 in 1 : vector<8x64xf32>, vector<8x64xf32> -> vector<8x128xf32>
    %53 = arith.truncf %52 : vector<8x128xf32> to vector<8x128xbf16>
    %c0_21 = arith.constant 0 : index
    %c0_22 = arith.constant 0 : index
    %c0_23 = arith.constant 0 : index
    %54 = vector.load %arg8[%c0_21, %c0_22, %c0_23] : memref<1x128x128xbf16, #tpu.memory_space<vmem>>, vector<1x128x128xbf16>
    %55 = vector.shape_cast %54 : vector<1x128x128xbf16> to vector<128x128xbf16>
    %cst_24 = arith.constant dense<0.000000e+00> : vector<8x128xf32>
    %56 = tpu.matmul %53, %55, %cst_24 {dimension_numbers = #tpu.dot_dimension_numbers<[1], [0], [0], [1], [0, 0, 1, 1], [], []>} : vector<8x128xbf16>, vector<128x128xbf16>, vector<8x128xf32> -> vector<8x128xf32>
    %c0_25 = arith.constant 0 : index
    %c0_26 = arith.constant 0 : index
    %c0_27 = arith.constant 0 : index
    %57 = vector.load %arg9[%c0_25, %c0_26, %c0_27] : memref<1x1x128xf32, #tpu.memory_space<vmem>>, vector<1x1x128xf32>
    %58 = vector.shape_cast %57 : vector<1x1x128xf32> to vector<1x128xf32>
    %59 = vector.broadcast %58 : vector<1x128xf32> to vector<8x128xf32>
    %60 = arith.addf %56, %59 : vector<8x128xf32>
    %61 = arith.addf %60, %3 : vector<8x128xf32>
    %c0_28 = arith.constant 0 : index
    %c0_29 = arith.constant 0 : index
    %c0_30 = arith.constant 0 : index
    %62 = vector.load %arg10[%c0_28, %c0_29, %c0_30] : memref<1x1x128xf32, #tpu.memory_space<vmem>>, vector<1x1x128xf32>
    %63 = vector.shape_cast %62 : vector<1x1x128xf32> to vector<1x128xf32>
    %c0_31 = arith.constant 0 : index
    %c0_32 = arith.constant 0 : index
    %c0_33 = arith.constant 0 : index
    %64 = vector.load %arg11[%c0_31, %c0_32, %c0_33] : memref<1x1x128xf32, #tpu.memory_space<vmem>>, vector<1x1x128xf32>
    %65 = vector.shape_cast %64 : vector<1x1x128xf32> to vector<1x128xf32>
    %cst_34 = arith.constant dense<0.000000e+00> : vector<8xf32>
    %66 = vector.multi_reduction <add>, %61, %cst_34 [1] : vector<8x128xf32> to vector<8xf32>
    %67 = vector.shape_cast %66 : vector<8xf32> to vector<8x1xf32>
    %cst_35 = arith.constant 1.280000e+02 : f32
    %68 = vector.broadcast %cst_35 : f32 to vector<8x1xf32>
    %69 = arith.divf %67, %68 : vector<8x1xf32>
    %70 = vector.broadcast %69 : vector<8x1xf32> to vector<8x128xf32>
    %71 = arith.subf %61, %70 : vector<8x128xf32>
    %72 = arith.mulf %71, %71 : vector<8x128xf32>
    %cst_36 = arith.constant dense<0.000000e+00> : vector<8xf32>
    %73 = vector.multi_reduction <add>, %72, %cst_36 [1] : vector<8x128xf32> to vector<8xf32>
    %74 = vector.shape_cast %73 : vector<8xf32> to vector<8x1xf32>
    %cst_37 = arith.constant 1.280000e+02 : f32
    %75 = vector.broadcast %cst_37 : f32 to vector<8x1xf32>
    %76 = arith.divf %74, %75 : vector<8x1xf32>
    %cst_38 = arith.constant 9.99999974E-6 : f32
    %77 = vector.broadcast %cst_38 : f32 to vector<8x1xf32>
    %78 = arith.addf %76, %77 : vector<8x1xf32>
    %79 = math.rsqrt %78 : vector<8x1xf32>
    %80 = vector.broadcast %79 : vector<8x1xf32> to vector<8x128xf32>
    %81 = arith.mulf %71, %80 : vector<8x128xf32>
    %82 = vector.broadcast %63 : vector<1x128xf32> to vector<8x128xf32>
    %83 = arith.mulf %81, %82 : vector<8x128xf32>
    %84 = vector.broadcast %65 : vector<1x128xf32> to vector<8x128xf32>
    %85 = arith.addf %83, %84 : vector<8x128xf32>
    %86 = arith.truncf %85 : vector<8x128xf32> to vector<8x128xbf16>
    %c0_39 = arith.constant 0 : index
    %c0_40 = arith.constant 0 : index
    %c0_41 = arith.constant 0 : index
    %87 = vector.load %arg12[%c0_39, %c0_40, %c0_41] : memref<1x128x512xbf16, #tpu.memory_space<vmem>>, vector<1x128x512xbf16>
    %88 = vector.shape_cast %87 : vector<1x128x512xbf16> to vector<128x512xbf16>
    %cst_42 = arith.constant dense<0.000000e+00> : vector<8x512xf32>
    %89 = tpu.matmul %86, %88, %cst_42 {dimension_numbers = #tpu.dot_dimension_numbers<[1], [0], [0], [1], [0, 0, 1, 1], [], []>} : vector<8x128xbf16>, vector<128x512xbf16>, vector<8x512xf32> -> vector<8x512xf32>
    %c0_43 = arith.constant 0 : index
    %c0_44 = arith.constant 0 : index
    %c0_45 = arith.constant 0 : index
    %90 = vector.load %arg13[%c0_43, %c0_44, %c0_45] : memref<1x1x512xf32, #tpu.memory_space<vmem>>, vector<1x1x512xf32>
    %91 = vector.shape_cast %90 : vector<1x1x512xf32> to vector<1x512xf32>
    %92 = vector.broadcast %91 : vector<1x512xf32> to vector<8x512xf32>
    %93 = arith.addf %89, %92 : vector<8x512xf32>
    %cst_46 = arith.constant 5.000000e-01 : f32
    %94 = vector.broadcast %cst_46 : f32 to vector<8x512xf32>
    %95 = arith.mulf %94, %93 : vector<8x512xf32>
    %cst_47 = arith.constant 4.471500e-02 : f32
    %96 = vector.broadcast %cst_47 : f32 to vector<8x512xf32>
    %97 = arith.mulf %96, %93 : vector<8x512xf32>
    %98 = arith.mulf %97, %93 : vector<8x512xf32>
    %99 = arith.mulf %98, %93 : vector<8x512xf32>
    %100 = arith.addf %93, %99 : vector<8x512xf32>
    %cst_48 = arith.constant 0.797884583 : f32
    %101 = vector.broadcast %cst_48 : f32 to vector<8x512xf32>
    %102 = arith.mulf %101, %100 : vector<8x512xf32>
    %103 = math.tanh %102 : vector<8x512xf32>
    %cst_49 = arith.constant 1.000000e+00 : f32
    %104 = vector.broadcast %cst_49 : f32 to vector<8x512xf32>
    %105 = arith.addf %104, %103 : vector<8x512xf32>
    %106 = arith.mulf %95, %105 : vector<8x512xf32>
    %107 = arith.truncf %106 : vector<8x512xf32> to vector<8x512xbf16>
    %c0_50 = arith.constant 0 : index
    %c0_51 = arith.constant 0 : index
    %c0_52 = arith.constant 0 : index
    %108 = vector.load %arg14[%c0_50, %c0_51, %c0_52] : memref<1x512x128xbf16, #tpu.memory_space<vmem>>, vector<1x512x128xbf16>
    %109 = vector.shape_cast %108 : vector<1x512x128xbf16> to vector<512x128xbf16>
    %cst_53 = arith.constant dense<0.000000e+00> : vector<8x128xf32>
    %110 = tpu.matmul %107, %109, %cst_53 {dimension_numbers = #tpu.dot_dimension_numbers<[1], [0], [0], [1], [0, 0, 1, 1], [], []>} : vector<8x512xbf16>, vector<512x128xbf16>, vector<8x128xf32> -> vector<8x128xf32>
    %c0_54 = arith.constant 0 : index
    %c0_55 = arith.constant 0 : index
    %c0_56 = arith.constant 0 : index
    %111 = vector.load %arg15[%c0_54, %c0_55, %c0_56] : memref<1x1x128xf32, #tpu.memory_space<vmem>>, vector<1x1x128xf32>
    %112 = vector.shape_cast %111 : vector<1x1x128xf32> to vector<1x128xf32>
    %113 = vector.broadcast %112 : vector<1x128xf32> to vector<8x128xf32>
    %114 = arith.addf %110, %113 : vector<8x128xf32>
    %115 = arith.addf %114, %85 : vector<8x128xf32>
    %c0_57 = arith.constant 0 : index
    %c0_58 = arith.constant 0 : index
    %c0_59 = arith.constant 0 : index
    %116 = vector.load %arg16[%c0_57, %c0_58, %c0_59] : memref<1x1x128xf32, #tpu.memory_space<vmem>>, vector<1x1x128xf32>
    %117 = vector.shape_cast %116 : vector<1x1x128xf32> to vector<1x128xf32>
    %c0_60 = arith.constant 0 : index
    %c0_61 = arith.constant 0 : index
    %c0_62 = arith.constant 0 : index
    %118 = vector.load %arg17[%c0_60, %c0_61, %c0_62] : memref<1x1x128xf32, #tpu.memory_space<vmem>>, vector<1x1x128xf32>
    %119 = vector.shape_cast %118 : vector<1x1x128xf32> to vector<1x128xf32>
    %cst_63 = arith.constant dense<0.000000e+00> : vector<8xf32>
    %120 = vector.multi_reduction <add>, %115, %cst_63 [1] : vector<8x128xf32> to vector<8xf32>
    %121 = vector.shape_cast %120 : vector<8xf32> to vector<8x1xf32>
    %cst_64 = arith.constant 1.280000e+02 : f32
    %122 = vector.broadcast %cst_64 : f32 to vector<8x1xf32>
    %123 = arith.divf %121, %122 : vector<8x1xf32>
    %124 = vector.broadcast %123 : vector<8x1xf32> to vector<8x128xf32>
    %125 = arith.subf %115, %124 : vector<8x128xf32>
    %126 = arith.mulf %125, %125 : vector<8x128xf32>
    %cst_65 = arith.constant dense<0.000000e+00> : vector<8xf32>
    %127 = vector.multi_reduction <add>, %126, %cst_65 [1] : vector<8x128xf32> to vector<8xf32>
    %128 = vector.shape_cast %127 : vector<8xf32> to vector<8x1xf32>
    %cst_66 = arith.constant 1.280000e+02 : f32
    %129 = vector.broadcast %cst_66 : f32 to vector<8x1xf32>
    %130 = arith.divf %128, %129 : vector<8x1xf32>
    %cst_67 = arith.constant 9.99999974E-6 : f32
    %131 = vector.broadcast %cst_67 : f32 to vector<8x1xf32>
    %132 = arith.addf %130, %131 : vector<8x1xf32>
    %133 = math.rsqrt %132 : vector<8x1xf32>
    %134 = vector.broadcast %133 : vector<8x1xf32> to vector<8x128xf32>
    %135 = arith.mulf %125, %134 : vector<8x128xf32>
    %136 = vector.broadcast %117 : vector<1x128xf32> to vector<8x128xf32>
    %137 = arith.mulf %135, %136 : vector<8x128xf32>
    %138 = vector.broadcast %119 : vector<1x128xf32> to vector<8x128xf32>
    %139 = arith.addf %137, %138 : vector<8x128xf32>
    %c0_68 = arith.constant 0 : index
    %c0_69 = arith.constant 0 : index
    %140 = vector.load %arg23[%c0_68, %c0_69] : memref<8x128xf32, #tpu.memory_space<vmem>>, vector<8x128xf32>
    tpu.vector_store %arg23[%c0_68, %c0_69], %139 {strides = array<i32>} : memref<8x128xf32, #tpu.memory_space<vmem>>, vector<8x128xf32>,
    %c1_i32 = arith.constant 1 : i32
    %141 = arith.cmpi eq, %arg1, %c1_i32 : i32
    %142 = arith.extui %141 : i1 to i32
    %c0_i32_70 = arith.constant 0 : i32
    %143 = arith.cmpi ne, %142, %c0_i32_70 : i32
    scf.if %143 {
      %144 = vector.extract_strided_slice %139 {offsets = [0, 0], sizes = [1, 128], strides = [1, 1]} : vector<8x128xf32> to vector<1x128xf32>
      %145 = arith.truncf %144 : vector<1x128xf32> to vector<1x128xbf16>
      %c0_71 = arith.constant 0 : index
      %c0_72 = arith.constant 0 : index
      %146 = vector.load %arg18[%c0_71, %c0_72] : memref<128x128xbf16, #tpu.memory_space<vmem>>, vector<128x128xbf16>
      %cst_73 = arith.constant dense<0.000000e+00> : vector<1x128xf32>
      %147 = tpu.matmul %145, %146, %cst_73 {dimension_numbers = #tpu.dot_dimension_numbers<[1], [0], [0], [1], [0, 0, 1, 1], [], []>} : vector<1x128xbf16>, vector<128x128xbf16>, vector<1x128xf32> -> vector<1x128xf32>
      %c0_74 = arith.constant 0 : index
      %c0_75 = arith.constant 0 : index
      %148 = vector.load %arg19[%c0_74, %c0_75] : memref<1x128xf32, #tpu.memory_space<vmem>>, vector<1x128xf32>
      %149 = arith.addf %147, %148 : vector<1x128xf32>
      %150 = math.tanh %149 : vector<1x128xf32>
      %c0_76 = arith.constant 0 : index
      %c0_77 = arith.constant 0 : index
      %151 = vector.load %arg20[%c0_76, %c0_77] : memref<128x1xf32, #tpu.memory_space<vmem>>, vector<128x1xf32>
      %cst_78 = arith.constant dense<0.000000e+00> : vector<1x1xf32>
      %152 = tpu.matmul %150, %151, %cst_78 {dimension_numbers = #tpu.dot_dimension_numbers<[1], [0], [0], [1], [0, 0, 1, 1], [], []>} : vector<1x128xf32>, vector<128x1xf32>, vector<1x1xf32> -> vector<1x1xf32>
      %c0_79 = arith.constant 0 : index
      %c0_80 = arith.constant 0 : index
      %153 = vector.load %arg21[%c0_79, %c0_80] : memref<1x1xf32, #tpu.memory_space<vmem>>, vector<1x1xf32>
      %154 = arith.addf %152, %153 : vector<1x1xf32>
      %c0_81 = arith.constant 0 : index
      %c0_82 = arith.constant 0 : index
      %c0_83 = arith.constant 0 : index
      %155 = vector.load %arg22[%c0_81, %c0_82, %c0_83] : memref<1x1x1xf32, #tpu.memory_space<vmem>>, vector<1x1x1xf32>
      %156 = vector.shape_cast %155 : vector<1x1x1xf32> to vector<1x1xf32>
      %157 = vector.shape_cast %154 : vector<1x1xf32> to vector<1x1x1xf32>
      tpu.vector_store %arg22[%c0_81, %c0_82, %c0_83], %157 {strides = array<i32>} : memref<1x1x1xf32, #tpu.memory_space<vmem>>, vector<1x1x1xf32>,
    } else {
    }
    return
  }
  func.func @transform_0(%arg0: i32, %arg1: i32) -> (i32, i32, i32) {
    %c0_i32 = arith.constant 0 : i32
    %c0_i32_0 = arith.constant 0 : i32
    %c0_i32_1 = arith.constant 0 : i32
    return %arg0, %c0_i32, %c0_i32_0 : i32, i32, i32
  }
  func.func @transform_1(%arg0: i32, %arg1: i32) -> (i32, i32, i32) {
    %c0_i32 = arith.constant 0 : i32
    %c0_i32_0 = arith.constant 0 : i32
    %c0_i32_1 = arith.constant 0 : i32
    return %arg0, %c0_i32, %c0_i32_0 : i32, i32, i32
  }
  func.func @transform_2(%arg0: i32, %arg1: i32) -> (i32, i32) {
    %c0_i32 = arith.constant 0 : i32
    %c0_i32_0 = arith.constant 0 : i32
    %c0_i32_1 = arith.constant 0 : i32
    return %c0_i32, %c0_i32_0 : i32, i32
  }
  func.func @transform_3(%arg0: i32, %arg1: i32) -> (i32, i32) {
    %c0_i32 = arith.constant 0 : i32
    %c0_i32_0 = arith.constant 0 : i32
    %c0_i32_1 = arith.constant 0 : i32
    return %c0_i32, %c0_i32_0 : i32, i32
  }
  func.func @transform_4(%arg0: i32, %arg1: i32) -> (i32, i32, i32) {
    %c0_i32 = arith.constant 0 : i32
    %c0_i32_0 = arith.constant 0 : i32
    %c0_i32_1 = arith.constant 0 : i32
    return %arg1, %c0_i32, %c0_i32_0 : i32, i32, i32
  }
  func.func @transform_5(%arg0: i32, %arg1: i32) -> (i32, i32, i32) {
    %c0_i32 = arith.constant 0 : i32
    %c0_i32_0 = arith.constant 0 : i32
    %c0_i32_1 = arith.constant 0 : i32
    return %arg1, %c0_i32, %c0_i32_0 : i32, i32, i32
  }
  func.func @transform_6(%arg0: i32, %arg1: i32) -> (i32, i32, i32) {
    %c0_i32 = arith.constant 0 : i32
    %c0_i32_0 = arith.constant 0 : i32
    %c0_i32_1 = arith.constant 0 : i32
    return %arg1, %c0_i32, %c0_i32_0 : i32, i32, i32
  }
  func.func @transform_7(%arg0: i32, %arg1: i32) -> (i32, i32, i32) {
    %c0_i32 = arith.constant 0 : i32
    %c0_i32_0 = arith.constant 0 : i32
    %c0_i32_1 = arith.constant 0 : i32
    return %arg1, %c0_i32, %c0_i32_0 : i32, i32, i32
  }
  func.func @transform_8(%arg0: i32, %arg1: i32) -> (i32, i32, i32) {
    %c0_i32 = arith.constant 0 : i32
    %c0_i32_0 = arith.constant 0 : i32
    %c0_i32_1 = arith.constant 0 : i32
    return %arg1, %c0_i32, %c0_i32_0 : i32, i32, i32
  }
  func.func @transform_9(%arg0: i32, %arg1: i32) -> (i32, i32, i32) {
    %c0_i32 = arith.constant 0 : i32
    %c0_i32_0 = arith.constant 0 : i32
    %c0_i32_1 = arith.constant 0 : i32
    return %arg1, %c0_i32, %c0_i32_0 : i32, i32, i32
  }
  func.func @transform_10(%arg0: i32, %arg1: i32) -> (i32, i32, i32) {
    %c0_i32 = arith.constant 0 : i32
    %c0_i32_0 = arith.constant 0 : i32
    %c0_i32_1 = arith.constant 0 : i32
    return %arg1, %c0_i32, %c0_i32_0 : i32, i32, i32
  }
  func.func @transform_11(%arg0: i32, %arg1: i32) -> (i32, i32, i32) {
    %c0_i32 = arith.constant 0 : i32
    %c0_i32_0 = arith.constant 0 : i32
    %c0_i32_1 = arith.constant 0 : i32
    return %arg1, %c0_i32, %c0_i32_0 : i32, i32, i32
  }
  func.func @transform_12(%arg0: i32, %arg1: i32) -> (i32, i32, i32) {
    %c0_i32 = arith.constant 0 : i32
    %c0_i32_0 = arith.constant 0 : i32
    %c0_i32_1 = arith.constant 0 : i32
    return %arg1, %c0_i32, %c0_i32_0 : i32, i32, i32
  }
  func.func @transform_13(%arg0: i32, %arg1: i32) -> (i32, i32, i32) {
    %c0_i32 = arith.constant 0 : i32
    %c0_i32_0 = arith.constant 0 : i32
    %c0_i32_1 = arith.constant 0 : i32
    return %arg1, %c0_i32, %c0_i32_0 : i32, i32, i32
  }
  func.func @transform_14(%arg0: i32, %arg1: i32) -> (i32, i32, i32) {
    %c0_i32 = arith.constant 0 : i32
    %c0_i32_0 = arith.constant 0 : i32
    %c0_i32_1 = arith.constant 0 : i32
    return %arg1, %c0_i32, %c0_i32_0 : i32, i32, i32
  }
  func.func @transform_15(%arg0: i32, %arg1: i32) -> (i32, i32, i32) {
    %c0_i32 = arith.constant 0 : i32
    %c0_i32_0 = arith.constant 0 : i32
    %c0_i32_1 = arith.constant 0 : i32
    return %arg1, %c0_i32, %c0_i32_0 : i32, i32, i32
  }
  func.func @transform_16(%arg0: i32, %arg1: i32) -> (i32, i32) {
    %c0_i32 = arith.constant 0 : i32
    %c0_i32_0 = arith.constant 0 : i32
    %c0_i32_1 = arith.constant 0 : i32
    return %c0_i32, %c0_i32_0 : i32, i32
  }
  func.func @transform_17(%arg0: i32, %arg1: i32) -> (i32, i32) {
    %c0_i32 = arith.constant 0 : i32
    %c0_i32_0 = arith.constant 0 : i32
    %c0_i32_1 = arith.constant 0 : i32
    return %c0_i32, %c0_i32_0 : i32, i32
  }
  func.func @transform_18(%arg0: i32, %arg1: i32) -> (i32, i32) {
    %c0_i32 = arith.constant 0 : i32
    %c0_i32_0 = arith.constant 0 : i32
    %c0_i32_1 = arith.constant 0 : i32
    return %c0_i32, %c0_i32_0 : i32, i32
  }
  func.func @transform_19(%arg0: i32, %arg1: i32) -> (i32, i32) {
    %c0_i32 = arith.constant 0 : i32
    %c0_i32_0 = arith.constant 0 : i32
    %c0_i32_1 = arith.constant 0 : i32
    return %c0_i32, %c0_i32_0 : i32, i32
  }
  func.func @transform_20(%arg0: i32, %arg1: i32) -> (i32, i32, i32) {
    %c0_i32 = arith.constant 0 : i32
    %c0_i32_0 = arith.constant 0 : i32
    %c0_i32_1 = arith.constant 0 : i32
    return %arg0, %c0_i32, %c0_i32_0 : i32, i32, i32
  }
}

</mosaic_0001>

<bundles_post_ra>
// kernel: toxic_model_forward.1
= control target key start
LH: loop header
LB: loop body
LE: loop exit
PB: predicated region body
PF: predicated region fallthrough
CT: control target
= control target key end

     0   :  { %s4319_s0 = inlined_call_operand.vmem [shape: f32[2,8,128], index: 0, kind: input, shape index: {}]   ;;  %s4320_s1 = inlined_call_operand.vmem [shape: f32[2,1,8], index: 1, kind: input, shape index: {}]   ;;  %s4321_s2 = inlined_call_operand.vmem [shape: f32[1,128], index: 2, kind: input, shape index: {}]   ;;  %s4322_s3 = inlined_call_operand.vmem [shape: f32[1,128], index: 3, kind: input, shape index: {}]   ;;  %s4323_s4 = inlined_call_operand.hbm [shape: bf16[2,128,384], index: 4, kind: input, shape index: {}]   ;;  %s4324_s5 = inlined_call_operand.vmem [shape: f32[2,1,384], index: 5, kind: input, shape index: {}]   ;;  %s4325_s6 = inlined_call_operand.hbm [shape: bf16[2,128,128], index: 6, kind: input, shape index: {}]   ;;  %s4326_s7 = inlined_call_operand.vmem [shape: f32[2,1,128], index: 7, kind: input, shape index: {}]   ;;  %s4327_s8 = inlined_call_operand.vmem [shape: f32[2,1,128], index: 8, kind: input, shape index: {}]   ;;  %s4328_s9 = inlined_call_operand.vmem [shape: f32[2,1,128], index: 9, kind: input, shape index: {}]   ;;  %s4329_s10 = inlined_call_operand.vmem [shape: bf16[2,128,512], index: 10, kind: input, shape index: {}]   ;;  %s4330_s11 = inlined_call_operand.vmem [shape: f32[2,1,512], index: 11, kind: input, shape index: {}]   ;;  %s4331_s12 = inlined_call_operand.hbm [shape: bf16[2,512,128], index: 12, kind: input, shape index: {}]   ;;  %s4332_s13 = inlined_call_operand.vmem [shape: f32[2,1,128], index: 13, kind: input, shape index: {}]   ;;  %s4333_s14 = inlined_call_operand.vmem [shape: f32[2,1,128], index: 14, kind: input, shape index: {}]   ;;  %s4334_s15 = inlined_call_operand.vmem [shape: f32[2,1,128], index: 15, kind: input, shape index: {}]   ;;  %s4335_s16 = inlined_call_operand.hbm [shape: bf16[128,128], index: 16, kind: input, shape index: {}]   ;;  %s4336_s17 = inlined_call_operand.vmem [shape: f32[1,128], index: 17, kind: input, shape index: {}]   ;;  %s4337_s18 = inlined_call_operand.vmem [shape: f32[128,1], index: 18, kind: input, shape index: {}]   ;;  %s4338_s19 = inlined_call_operand.<no memory space> [shape: f32[1,1], index: 19, kind: input, shape index: {}]   ;;  %s4339_s20 = inlined_call_operand.vmem [shape: f32[2,1,1], index: 20, kind: output, shape index: {}]  }
   0x1   :  { %4352 = sst [smem:[#allocation22_spill]] %s4319_s0  ;;  %v25_v0 = vstv %s4338_s19 }
   0x2   :  { %4353 = sst [smem:[#allocation23_spill]] %s4320_s1  ;;  %26 = vst [vmem:[#allocation3] sm:$0x1] %v25_v0 }
   0x3   :  { %4354 = sst [smem:[#allocation24_spill]] %s4321_s2 }
   0x4   :  { %4355 = sst [smem:[#allocation25_spill]] %s4322_s3 }
   0x5   :  { %4356 = sst [smem:[#allocation26_spill]] %s4323_s4 }
   0x6   :  { %4357 = sst [smem:[#allocation27_spill]] %s4324_s5 }
   0x7   :  { %4358 = sst [smem:[#allocation28_spill]] %s4325_s6 }
   0x8   :  { %4359 = sst [smem:[#allocation29_spill]] %s4327_s8 }
   0x9   :  { %4360 = sst [smem:[#allocation30_spill]] %s4328_s9 }
   0xa   :  { %4361 = sst [smem:[#allocation31_spill]] %s4329_s10 }
   0xb   :  { %4362 = sst [smem:[#allocation32_spill]] %s4330_s11 }
   0xc   :  { %4363 = sst [smem:[#allocation33_spill]] %s4331_s12 }
   0xd   :  { %4364 = sst [smem:[#allocation34_spill]] %s4332_s13 }
   0xe   :  { %4365 = sst [smem:[#allocation35_spill]] %s4333_s14 }
   0xf   :  { %4366 = sst [smem:[#allocation36_spill]] %s4334_s15 }
  0x10   :  { %4367 = sst [smem:[#allocation37_spill]] %s4335_s16 }
  0x11   :  { %4368 = sst [smem:[#allocation38_spill]] %s4336_s17 }
  0x12   :  { %4369 = sst [smem:[#allocation39_spill]] %s4337_s18 }
  0x13   :  { %4370 = sst [smem:[#allocation40_spill]] %s4339_s20 }
  0x14   :  { %27 = vsyncpa [#allocation5], 0 }
  0x15   :  { %29 = vsyncpa [#allocation5 + $0x1], 0 }
  0x16   :  { %30 = vsyncpa [#allocation7], 0 }
  0x17   :  { %32 = vsyncpa [#allocation7 + $0x1], 0 }
  0x18   :  { %33 = vsyncpa [#allocation10], 0  ;;  %s3767_s23 = smov 0   ;;  %s3769_s24 = smov 0  }
  0x19   :  { %s3771_s2 = smov 0   ;;  %s3773_s25 = smov 0  }
  0x1a   :  { %s3775_s3 = smov 0   ;;  %s3777_s26 = smov 0  }
  0x1b   :  { %s3779_s27 = smov 0   ;;  %s3781_s19 = smov 0  }
  0x1c LB: > { %4371 = sst [smem:[#allocation14_spill]] %s3619_s24  ;;  %s48_s28 = sadd.s32 1, %s3635_s26  ;;  %s3643_s19 = sphi %s3781_s19, %s39_s19   ;;  %s3639_s27 = sphi %s3779_s27, %s4425_s27   ;;  %s3635_s26 = sphi %s3777_s26, %s4424_s26   ;;  %s3631_s3 = sphi %s3775_s3, %s4423_s3   ;;  %s3627_s25 = sphi %s3773_s25, %s4422_s25   ;;  %s3623_s2 = sphi %s3771_s2, %s4421_s2   ;;  %s3619_s24 = sphi %s3769_s24, %s4420_s24   ;;  %s3615_s23 = sphi %s3767_s23, %s4419_s23  }
  0x1d   : > { %4372 = sst [smem:[#allocation15_spill]] %s3623_s2  ;;  %s51_s4 = sadd.s32 1, %s3639_s27 }
  0x1e   : > { %4373 = sst [smem:[#allocation16_spill]] %s3635_s26  ;;  %p49_p0 = scmp.ge.s32.totalorder %s48_s28, 2 }
  0x1f   : > { %4374 = sst [smem:[#allocation17_spill]] %s3639_s27  ;;  %s152_s29 = sadd.s32 1, %s3623_s2 }
  0x20   : > { %4375 = sst [smem:[#allocation18_spill]] %s3643_s19  ;;  %p159_p1 = scmp.ne.s32.totalorder %s3623_s2, %s3619_s24 }
  0x21   : > { %p160_p2 = scmp.eq.s32.totalorder %s3643_s19, 0  ;;  %s4427_s28 = smov (%p49_p0, %s48_s28), 0 }
  0x22   : > { %4376 = sst [smem:[#allocation19_spill]] %s4427_s28  ;;  %s4429_s4 = smov (!%p49_p0, %s51_s4), %s3639_s27 }
  0x23   : > { %s149_s30 = ssub.s32 %s3635_s26, %s4427_s28  ;;  %p161_p3 = por %p160_p2, %p159_p1 }
  0x24   : > { %p53_p4 = scmp.ge.s32.totalorder %s4429_s4, 2  ;;  %p150_p5 = scmp.eq.s32.totalorder %s149_s30, 0 }
  0x25   : > { %p3230_p6 = scmp.lt.s32.totalorder %s3643_s19, 4  ;;  %s3825_s21 = sand.u32 1, %s3623_s2  }
  0x26   : > { %s4431_s4 = smov (%p53_p4, %s4429_s4), 0  ;;  %s654_s1 = sand.u32 1, %s3643_s19  }
  0x27   : > { %4377 = sst [smem:[#allocation20_spill]] %s4431_s4  ;;  %p3828_p7 = pnand %p3230_p6, %p161_p3 }
  0x28   : > { %s3821_s0 = scalar_select %p150_p5, %s3623_s2, %s152_s29  }
  0x29   : > { %s2850_s27 = sshll.u32 %s3825_s21, 6  ;;  %s2987_s28 = sshll.u32 %s3635_s26, 10 }
  0x2a   : > { %4378 = sst [smem:[#allocation21_spill]] %s3821_s0  ;;  %s658_s4 = scalar_lea.vmem [#allocation6], %s2850_s27 }
  0x2b   : > { %s4380_s6 = sld [smem:[#allocation28_spill]]  ;;  %s665_s29 = sshll.u32 %s658_s4, 4  ;;  %s666_s29 = int_to_ptr.vmem [resolvable:$true] %s665_s29 }
  0x2c   : > { %s3837_s0 = scalar_lea.sflag [#allocation7], %s654_s1  ;;  %p4347_p8 = pneg %p3828_p7 }
  0x2d   : > { %s3472_s2 = scalar_lea.vmem %s666_s29, 1024  ;;  %s3645_s20 = smov [#allocation6]  }
  0x2e   : > { %p3473_p9 = scmp.ne.s32.totalorder %s666_s29, %s3472_s2  ;;  %s3477_s15 = sshll.u32 %s3645_s20, 4  ;;  %s3478_s15 = int_to_ptr.vmem [resolvable:$false] %s3477_s15 }
  0x2f   : > { %s3479_s14 = scalar_lea.vmem %s3478_s15, 2048  ;;  %p3480_p12 = scmp.lt.s32.totalorder %s666_s29, %s3478_s15 }
  0x30   : > { %p3475_p10 = pnand %p3473_p9, %p4347_p8  ;;  %p3481_p13 = scmp.lt.s32.totalorder %s3479_s14, %s3472_s2 }
  0x31   : > { %s664_s30 = scalar_lea.hbm %s4380_s6, %s2987_s28 }
  0x32   : > { %p3476_p11 = pneg %p3475_p10  ;;  %p3482_p0 = por %p3481_p13, %p3480_p12 }
  0x34   : > { %p3483_p1 = pnand %p3482_p0, %p3476_p11 }
  0x36   : > { %3486 = shalt.err (!%p3483_p1)
}
  0x37   : > { %s4345_s17 = smov 64   ;;  %s4348_s18 = smov 4  }
  0x38   : > { %3225 = dma.hbm_to_vmem [thread:$0]  (!%p3828_p7), %s664_s30, 1024, %s666_s29, %s3837_s0, %s4345_s17, %s4345_s17, %s4348_s18  }
  0x39   : > { %s4344_s14 = sadd.s32 4294967295, %s3643_s19   ;;  %p165_p2 = scmp.ne.s32.totalorder %s3619_s24, %s3615_s23 }
  0x3a   : > { %p3855_p3 = scmp.eq.s32.totalorder %s4344_s14, 0  ;;  %p2846_p4 = scmp.ge.s32.totalorder %s3643_s19, 1 }
  0x3b   : > { %p572_p5 = scmp.lt.s32.totalorder %s3643_s19, 5  ;;  %s3648_s23 = smov [#allocation9]  }
  0x3c   : > { %p3863_p6 = por %p3855_p3, %p165_p2  ;;  %s590_s27 = sshll.u32 %s3648_s23, 4  ;;  %s591_s27 = int_to_ptr.vmem [resolvable:$true] %s590_s27 }
  0x3d   : > { %p3867_p9 = pnand %p2846_p4, %p572_p5  ;;  %s3201_s28 = smul.u32 192, %s3825_s21 }
  0x3e   : > { %s3202_s4 = smul.u32 3072, %s3635_s26  ;;  %s4384_s29 = sld [smem:[#allocation26_spill]] }
  0x3f   : > { %p3215_p10 = pneg %p3867_p9  ;;  %s3498_s17 = scalar_lea.vmem %s591_s27, 1024 }
  0x40   : > { %p3499_p13 = scmp.ne.s32.totalorder %s591_s27, %s3498_s17  ;;  %p3506_p2 = scmp.lt.s32.totalorder %s591_s27, %s591_s27 }
  0x41   : > { %p3216_p11 = pnand %p3215_p10, %p3855_p3  ;;  %p3507_p4 = scmp.lt.s32.totalorder %s3498_s17, %s3498_s17 }
  0x43   : > { %p3489_p12 = pneg %p3216_p11  ;;  %p3508_p5 = por %p3507_p4, %p3506_p2 }
  0x44   : > { %s3880_s14 = scalar_lea.hbm %s4384_s29, %s3202_s4 }
  0x45   : > { %p3501_p0 = pnand %p3499_p13, %p3489_p12 }
  0x47   : > { %p3502_p1 = pneg %p3501_p0 }
  0x49   : > { %p3509_p8 = pnand %p3508_p5, %p3502_p1 }
  0x4b   : > { %3512 = shalt.err (!%p3509_p8)
}
  0x4c   : > { %s4385_s23 = smov 64   ;;  %s4386_s16 = sld [smem:[#allocation37_spill]] }
  0x4d   : > { %s630_s4 = scalar_lea.vmem [#allocation4], %s3201_s28  ;;  %s2853_s30 = sshll.u32 %s3825_s21, 8 }
  0x4e   : > { %s637_s1 = sshll.u32 %s630_s4, 4  ;;  %s627_s29 = scalar_lea.sflag [#allocation5], %s3825_s21  ;;  %s638_s1 = int_to_ptr.vmem [resolvable:$true] %s637_s1 }
  0x4f   : > { %s3526_s11 = scalar_lea.vmem %s638_s1, 3072  ;;  %p4387_p12 = pneg %p3828_p7 }
  0x50   : > { %p3527_p10 = scmp.ne.s32.totalorder %s638_s1, %s3526_s11  ;;  %s3649_s17 = smov [#allocation4]  }
  0x51   : > { %s3531_s10 = sshll.u32 %s3649_s17, 4  ;;  %s3532_s10 = int_to_ptr.vmem [resolvable:$false] %s3531_s10 }
  0x52   : > { %3218 = dma.hbm_to_vmem [thread:$0]  (!%p3216_p11), %s4386_s16, 1024, %s591_s27, [#allocation10], %s4385_s23, %s4385_s23, %s4348_s18  }
  0x53   : > { %p3529_p8 = pnand %p3527_p10, %p4387_p12  ;;  %s3533_s9 = scalar_lea.vmem %s3532_s10, 6144 }
  0x54   : > { %p3534_p0 = scmp.lt.s32.totalorder %s638_s1, %s3532_s10  ;;  %p3535_p1 = scmp.lt.s32.totalorder %s3533_s9, %s3526_s11 }
  0x55   : > { %p3530_p13 = pneg %p3529_p8 }
  0x56   : > { %p3536_p2 = por %p3535_p1, %p3534_p0 }
  0x58   : > { %p3537_p4 = pnand %p3536_p2, %p3530_p13 }
  0x5a   : > { %3540 = shalt.err (!%p3537_p4)
}
  0x5b   : > { %s3650_s6 = smov 192   ;;  %s3651_s13 = smov 12  }
  0x5c   : > { %3222 = dma.hbm_to_vmem [thread:$0]  (!%p3828_p7), %s3880_s14, 3072, %s638_s1, %s627_s29, %s3650_s6, %s3650_s6, %s3651_s13  }
  0x5d   : > { %s2988_s21 = sshll.u32 %s3635_s26, 12  ;;  %s712_s27 = scalar_lea.vmem [#allocation8], %s2853_s30 }
  0x5e   : > { %s719_s28 = sshll.u32 %s712_s27, 4  ;;  %s4388_s12 = sld [smem:[#allocation33_spill]]  ;;  %s720_s28 = int_to_ptr.vmem [resolvable:$true] %s719_s28 }
  0x5f   : > { %s3554_s9 = scalar_lea.vmem %s720_s28, 4096  ;;  %p4389_p5 = pmov %p4387_p12 }
  0x60   : > { %p3555_p11 = scmp.ne.s32.totalorder %s720_s28, %s3554_s9  ;;  %s3652_s10 = smov [#allocation8]  }
  0x61   : > { %s3559_s11 = sshll.u32 %s3652_s10, 4  ;;  %s3560_s11 = int_to_ptr.vmem [resolvable:$false] %s3559_s11 }
  0x62   : > { %p3557_p10 = pnand %p3555_p11, %p4389_p5  ;;  %s3561_s16 = scalar_lea.vmem %s3560_s11, 8192 }
  0x63   : > { %p3562_p8 = scmp.lt.s32.totalorder %s720_s28, %s3560_s11  ;;  %p3563_p13 = scmp.lt.s32.totalorder %s3561_s16, %s3554_s9 }
  0x64   : > { %s718_s18 = scalar_lea.hbm %s4388_s12, %s2988_s21  ;;  %p3558_p12 = pneg %p3557_p10 }
  0x65   : > { %p3564_p0 = por %p3563_p13, %p3562_p8 }
  0x67   : > { %p3565_p1 = pnand %p3564_p0, %p3558_p12 }
  0x69   : > { %3568 = shalt.err (!%p3565_p1)
}
  0x6a   : > { %s4390_s14 = smov 4   ;;  %749 = sbr.rel (%p3867_p9) target bundleno = 3694 (0xe6e), region = 100 }
  0x6b   : > { %3228 = dma.hbm_to_vmem [thread:$0]  (!%p3828_p7), %s718_s18, 4096, %s720_s28, %s3837_s0, %s4385_s23, %s4385_s23, %s4390_s14  }
  0x6c   : > { %s751_s1 = sand.u32 (!%p3867_p9), 1, %s3619_s24  }
  0x6d   : > { %s3203_s30 = smul.u32 (!%p3867_p9), 192, %s751_s1  ;;  %s752_s29 = scalar_lea.sflag (!%p3867_p9), [#allocation5], %s751_s1 }
  0x6f   : > { %s3912_s6 = scalar_lea.vmem [#allocation4], %s3203_s30 }
  0x70   : > { %3602 = dma.done.wait (%p3863_p6), %s752_s29, 3072  }
  0x71   : > { %3604 = vsyncadd (%p3863_p6), %s752_s29, 4294964224  ;;  %s4391_s16 = sadd.s32 4294967295, %s3643_s19   ;;  %s2857_s0 = sshll.u32 %s751_s1, 6 }
  0x72   : > { %s760_s22 = sand.u32 1, %s4391_s16   ;;  %s3920_s2 = scalar_lea.vmem [#allocation6], %s2857_s0 }
  0x73   : > { %s761_s18 = scalar_lea.sflag [#allocation7], %s760_s22 }
  0x74   : > { %3606 = dma.done.wait (%p3863_p6), %s761_s18, 5120  }
  0x75   : > { %3608 = vsyncadd (%p3863_p6), %s761_s18, 4294962176  ;;  %s2858_s23 = sshll.u32 %s751_s1, 8 }
  0x76   : > { %s3926_s13 = scalar_lea.vmem [#allocation8], %s2858_s23 }
  0x77   : > { %3610 = dma.done.wait (%p3855_p3), [#allocation10], 1024  }
  0x78   : > { %3612 = vsyncadd (%p3855_p3), [#allocation10], 4294966272  ;;  %p880_p7 = scmp.lt.s32.totalorder %s3631_s3, 1  ;;  %p887_p9 = scmp.lt.s32.totalorder %s3627_s25, 1 }
  0x79   : > { %s4393_s10 = sld [smem:[#allocation22_spill]]  ;;  %p2864_p3 = scmp.ne.s32.totalorder %s3627_s25, 0 }
  0x7a   : > { %s4433_s3 = smov (!%p880_p7, %s3631_s3), 1  ;;  %s4395_s5 = sld [smem:[#allocation27_spill]] }
  0x7b   : > { %s3938_s20 = scalar_select %p887_p9, %s3627_s25, 1 }
  0x7c   : > { %s2860_s15 = sshll.u32 %s4433_s3, 3  ;;  %s4397_s26 = sld [smem:[#allocation31_spill]] }
  0x7d   : > { %s3204_s14 = smul.u32 3, %s3938_s20  ;;  %s2989_s17 = sshll.u32 %s3938_s20, 8 }
  0x7e   : > { %s4398_s16 = sld [smem:[#allocation32_spill]] }
  0x7f   : > { %s883_s11 = scalar_lea.vmem %s4393_s10, %s2860_s15  ;;  %s2863_s15 = sshll.u32 %s3938_s20, 2 }
  0x80   : > { %s3960_s12 = scalar_lea.vmem %s4395_s5, %s3204_s14  ;;  %s4399_s14 = sld [smem:[#allocation34_spill]] }
  0x81   : > { %s4400_s21 = sld [smem:[#allocation35_spill]] }
  0x82   : > { %s3971_s1 = scalar_lea.vmem %s4397_s26, %s2989_s17  ;;  %s4401_s19 = sld [smem:[#allocation36_spill]] }
  0x83   : > { %s4402_s17 = sld [smem:[#allocation40_spill]] }
  0x84   : > { %s3976_s22 = scalar_lea.vmem %s4398_s16, %s2863_s15  ;;  %s4404_s0 = sld [smem:[#allocation25_spill]] (!%p2864_p3) }
  0x85   : > { %925 = sbr.rel (%p2864_p3) target bundleno = 446 (0x1be), region = 120 }
  0x86   : > { %s911_s23 = scalar_lea.vmem %s4399_s14, %s3938_s20 }
  0x87   : > { %s914_s27 = scalar_lea.vmem %s4400_s21, %s3938_s20 }
  0x88   : > { %s917_s8 = scalar_lea.vmem %s4401_s19, %s3938_s20  ;;  %s4403_s19 = sld [smem:[#allocation24_spill]] (!%p2864_p3) }
  0x89   : > { %s920_s10 = scalar_lea.vmem %s4402_s17, %s4433_s3 }
  0x8a   : > { %v926_v1 = vld [vmem:[%s883_s11] sm:$0xff] }
  0x8b   : > { %929 = vadd.xlane.f32.xlu0 %v926_v1  ;;  %v2866_v12 = vld [vmem:[%s4404_s0] ss:$0 sm:$0xff] }
  0x8e   : > { %v2865_v10 = vld [vmem:[%s4403_s19] ss:$0 sm:$0xff] }
 0x114   : > { %v930_v2 = vpop.xlane.xlu0 %929 }
 0x115   : > { %v932_v3 = vmul.f32 0.0078125, %v930_v2 }
 0x117   : > { %v933_v4 = vsub.f32 %v926_v1, %v932_v3 }
 0x119   : > { %v934_v5 = vmul.f32 %v933_v4, %v933_v4 }
 0x11b   : > { %935 = vadd.xlane.f32.xlu0 %v934_v5 }
 0x1a4   : > { %v936_v6 = vpop.xlane.xlu0 %935 }
 0x1a5   : > { %v937_v7 = vmul.f32 0.0078125, %v936_v6 }
 0x1a7   : > { %v938_v8 = vadd.f32 1e-05, %v937_v7 }
 0x1a9   : > { %3307 = vrsqrt.f32 %v938_v8 }
 0x1b6   : > { %v3308_v9 = vpop.eup %3307 }
 0x1b7   : > { %v940_v11 = vmul.f32 %v3308_v9, %v933_v4 }
 0x1b9   : > { %v947_v13 = vmul.f32 %v2865_v10, %v940_v11 }
 0x1bb   : > { %v954_v14 = vadd.f32 %v2866_v12, %v947_v13 }
 0x1bd   : > { %955 = vst [vmem:[#allocation2] sm:$0xff] %v954_v14 }
 0x1be PF: > { %v3309_v15 = vld [vmem:[%s3912_s6 + $0xac] ss:$12 sps:$4 sm:$0xff]   ;;  %v3311_v16 = vld [vmem:[%s3912_s6 + $0xa8] ss:$12 sps:$4 sm:$0xff]   ;;  %v3653_v17 = vmov 0   ;;  %v3654_v18 = vmov 0.0   ;;  %v993_v43 = vlaneseq  ;;  %s4407_s18 = scalar_lea.vmem %s4326_s7, %s3938_s20 }
 0x1bf   : > { %1168 = vmatprep.mubr.bf16.mxu0 %v3653_v17  ;;  %3086 = vmatprep.subr.bf16.mxu1 %v3654_v18  ;;  %v3312_v19 = vld [vmem:[%s3912_s6 + $0x94] ss:$12 sps:$4 sm:$0xff]   ;;  %vm3655_vm0 = vmmov 0   ;;  %v3314_v20 = vld [vmem:[%s3912_s6 + $0x90] ss:$12 sps:$4 sm:$0xff]   ;;  %vm1217_vm1 = vcmask 523264  }
 0x1c0   : > { %1136 = vmatprep.subr.bf16.mxu0 %v3309_v15  ;;  %3102 = vmatprep.mubr.msk.bf16.mxu1 %vm3655_vm0, %v3654_v18  ;;  %v3315_v21 = vld [vmem:[%s3912_s6 + $0x7c] ss:$12 sps:$4 sm:$0xff]   ;;  %v3317_v22 = vld [vmem:[%s3912_s6 + $0x78] ss:$12 sps:$4 sm:$0xff]   ;;  %v3320_v24 = vld [vmem:[%s3912_s6 + $0x60] ss:$12 sps:$4 sm:$0xff]  }
 0x1c1   : > { %1137 = vmatpush1.bf16.msra.mxu0 %v3311_v16  ;;  %v3318_v23 = vld [vmem:[%s3912_s6 + $0x64] ss:$12 sps:$4 sm:$0xff]   ;;  %v3321_v26 = vld [vmem:[%s3912_s6 + $0x4c] ss:$12 sps:$4 sm:$0xff]   ;;  %v3323_v28 = vld [vmem:[%s3912_s6 + $0x48] ss:$12 sps:$4 sm:$0xff]  }
 0x1c2   : > { %1138 = vmatprep.subr.bf16.mxu0 %v3312_v19  ;;  %v3333_v25 = vld [vmem:[%s3912_s6 + $0xb0] ss:$12 sps:$4 sm:$0xff]   ;;  %v3334_v27 = vld [vmem:[%s3912_s6 + $0x98] ss:$12 sps:$4 sm:$0xff]   ;;  %v3324_v29 = vld [vmem:[%s3912_s6 + $0x34] ss:$12 sps:$4 sm:$0xff]  }
 0x1c3   : > { %3087 = vmatpush3.bf16.msra.mxu1 %v3333_v25  ;;  %v3326_v30 = vld [vmem:[%s3912_s6 + $0x30] ss:$12 sps:$4 sm:$0xff]   ;;  %v3335_v31 = vld [vmem:[%s3912_s6 + $0x80] ss:$12 sps:$4 sm:$0xff]   ;;  %v3336_v33 = vld [vmem:[%s3912_s6 + $0x68] ss:$12 sps:$4 sm:$0xff]  }
 0x1c4   : > { %3088 = vmatprep.subr.bf16.mxu1 %v3654_v18  ;;  %v3327_v32 = vld [vmem:[%s3912_s6 + $0x1c] ss:$12 sps:$4 sm:$0xff]   ;;  %v3329_v34 = vld [vmem:[%s3912_s6 + $0x18] ss:$12 sps:$4 sm:$0xff]   ;;  %v3332_v37 = vld [vmem:[%s3912_s6] ss:$12 sps:$4 sm:$0xff]  }
 0x1c5   : > { %1139 = vmatpush1.bf16.msra.mxu0 %v3314_v20  ;;  %v3330_v35 = vld [vmem:[%s3912_s6 + $0x4] ss:$12 sps:$4 sm:$0xff]   ;;  %v4029_v38 = vld [vmem:[#allocation2] sm:$0xff]  ;;  %v3339_v41 = vld [vmem:[%s3912_s6 + $0x20] ss:$12 sps:$4 sm:$0xff]   ;;  %v4046_v44 = vshrl.u32 %v993_v43, 7 }
 0x1c6   : > { %1140 = vmatprep.subr.bf16.mxu0 %v3315_v21  ;;  %v3337_v36 = vld [vmem:[%s3912_s6 + $0x50] ss:$12 sps:$4 sm:$0xff]   ;;  %v3338_v39 = vld [vmem:[%s3912_s6 + $0x38] ss:$12 sps:$4 sm:$0xff]   ;;  %v957_v40 = vpack.c.bf16 %v4029_v38, %v4029_v38  ;;  %v3340_v42 = vld [vmem:[%s3912_s6 + $0x8] ss:$12 sps:$4 sm:$0xff]  }
 0x1c7   : > { %3089 = vmatpush3.bf16.msra.mxu1 %v3334_v27  ;;  %v999_v45 = vsub.s32 1, %v4046_v44  ;;  %v991_v46 = vld [vmem:[%s3960_s12] sm:$0x7]  ;;  %v995_v47 = vsub.s32 0, %v4046_v44  ;;  %v1003_v53 = vsub.s32 2, %v4046_v44  ;;  %s3656_s6 = smov 64  }
 0x1c8   : > { %3090 = vmatprep.subr.bf16.mxu1 %v3654_v18  ;;  %s4405_s15 = sld [smem:[#allocation23_spill]]  ;;  %vm1302_vm2 = vcmask 64512   ;;  %p2976_p6 = scmp.ne.s32.totalorder %s3627_s25, 1 }
 0x1c9   : > { %1141 = vmatpush1.bf16.msra.mxu0 %v3317_v22  ;;  %v1000_v48 = vrot.slane %v991_v46, %v999_v45  ;;  %v996_v50 = vrot.slane %v991_v46, %v995_v47  ;;  %v1004_v57 = vrot.slane %v991_v46, %v1003_v53  ;;  %s4408_s28 = sld [smem:[#allocation29_spill]] }
 0x1ca   : > { %1142 = vmatprep.subr.bf16.mxu0 %v3318_v23  ;;  %s4410_s17 = sld [smem:[#allocation30_spill]] }
 0x1cb   : > { %3091 = vmatpush3.bf16.msra.mxu1 %v3335_v31  ;;  %s4416_s16 = sld [smem:[#allocation38_spill]] (!%p2976_p6) }
 0x1cc   : > { %3092 = vmatprep.subr.bf16.mxu1 %v3654_v18 }
 0x1cd   : > { %1143 = vmatpush1.bf16.msra.mxu0 %v3320_v24 }
 0x1ce   : > { %1144 = vmatprep.subr.bf16.mxu0 %v3321_v26  ;;  %s4406_s30 = scalar_lea.vmem %s4405_s15, %s4433_s3 }
 0x1cf   : > { %3093 = vmatpush3.bf16.msra.mxu1 %v3336_v33  ;;  %v2893_v0 = vld [vmem:[%s4406_s30] ss:$0 sm:$0xff]  ;;  %v3341_v33 = vld [vmem:[%s3920_s2 + $0x38] sm:$0xff]   ;;  %s4409_s9 = scalar_lea.vmem %s4408_s28, %s3938_s20 }
 0x1d0   : > { %3094 = vmatprep.subr.bf16.mxu1 %v3654_v18  ;;  %s4411_s5 = scalar_lea.vmem %s4410_s17, %s3938_s20  ;;  %s4415_s20 = sld [smem:[#allocation39_spill]] (!%p2976_p6) }
 0x1d1   : > { %1145 = vmatpush1.bf16.msra.mxu0 %v3323_v28 }
 0x1d2   : > { %1146 = vmatprep.subr.bf16.mxu0 %v3324_v29 }
 0x1d3   : > { %3095 = vmatpush3.bf16.msra.mxu1 %v3337_v36  ;;  %v3344_v36 = vld [vmem:[%s3920_s2 + $0x20] sm:$0xff]  }
 0x1d4   : > { %3096 = vmatprep.subr.bf16.mxu1 %v3654_v18 }
 0x1d5   : > { %1147 = vmatpush1.bf16.msra.mxu0 %v3326_v30 }
 0x1d6   : > { %1148 = vmatprep.subr.bf16.mxu0 %v3327_v32 }
 0x1d7   : > { %3097 = vmatpush3.bf16.msra.mxu1 %v3338_v39  ;;  %v3346_v39 = vld [vmem:[%s3920_s2 + $0x10] sm:$0xff]  }
 0x1d8   : > { %3098 = vmatprep.subr.bf16.mxu1 %v3654_v18 }
 0x1d9   : > { %1149 = vmatpush1.bf16.msra.mxu0 %v3329_v34  ;;  %v3342_v34 = vld [vmem:[%s3920_s2 + $0x30] sm:$0xff]  }
 0x1da   : > { %1150 = vmatprep.subr.bf16.mxu0 %v3330_v35  ;;  %v3343_v35 = vld [vmem:[%s3920_s2 + $0x28] sm:$0xff]  }
 0x1db   : > { %3099 = vmatpush3.bf16.msra.mxu1 %v3339_v41  ;;  %v3348_v41 = vld [vmem:[%s3920_s2] sm:$0xff]  }
 0x1dc   : > { %3100 = vmatprep.subr.bf16.mxu1 %v3654_v18 }
 0x1dd   : > { %1151 = vmatpush1.bf16.msra.mxu0 %v3332_v37  ;;  %v3345_v37 = vld [vmem:[%s3920_s2 + $0x18] sm:$0xff]  }
 0x1de   : > { %3126 = vmatprep.subr.bf16.mxu0 %v3654_v18 }
 0x1df   : > { %3101 = vmatpush3.bf16.msra.mxu1 %v3340_v42 }
 0x1e0   : > { %1169 = vmatmul.mubr.bf16.vlgmr.msra.gmra.mxu0 %v957_v40  ;;  %3106 = vmatprep.subr.mxu1 %v3654_v18 }
 0x1e1   : > { %3142 = vmatprep.mubr.msk.bf16.mxu0 %vm3655_vm0, %v3654_v18  ;;  %3127 = vmatpush3.bf16.msra.mxu0 %v3341_v33  ;;  %v2907_v33 = vld [vmem:[%s4409_s9] ss:$0 sm:$0xff] }
 0x1e2   : > { %3103 = vmatmul.mubr.bf16.vlgmr.msra.gmra.mxu1 %v957_v40  ;;  %3128 = vmatprep.subr.bf16.mxu0 %v3654_v18  ;;  %v3347_v40 = vld [vmem:[%s3920_s2 + $0x8] sm:$0xff]  }
 0x1e3   : > { %3108 = vmatprep.mubr.msk.f32.mxu1 %vm3655_vm0, %v3654_v18 }
 0x1e5   : > { %3129 = vmatpush3.bf16.msra.mxu0 %v3342_v34 }
 0x1e6   : > { %3130 = vmatprep.subr.bf16.mxu0 %v3654_v18 }
 0x1e9   : > { %3131 = vmatpush3.bf16.msra.mxu0 %v3343_v35  ;;  %v2908_v35 = vld [vmem:[%s4411_s5] ss:$0 sm:$0xff] }
 0x1ea   : > { %3132 = vmatprep.subr.bf16.mxu0 %v3654_v18 }
 0x1ed   : > { %3133 = vmatpush3.bf16.msra.mxu0 %v3344_v36 }
 0x1ee   : > { %3134 = vmatprep.subr.bf16.mxu0 %v3654_v18 }
 0x1f1   : > { %3135 = vmatpush3.bf16.msra.mxu0 %v3345_v37 }
 0x1f2   : > { %3136 = vmatprep.subr.bf16.mxu0 %v3654_v18 }
 0x1f5   : > { %3137 = vmatpush3.bf16.msra.mxu0 %v3346_v39 }
 0x1f6   : > { %3138 = vmatprep.subr.bf16.mxu0 %v3654_v18 }
 0x1f9   : > { %3139 = vmatpush3.bf16.msra.mxu0 %v3347_v40  ;;  %v3397_v40 = vld [vmem:[%s3926_s13 + $0x78] sm:$0xff]  }
 0x1fa   : > { %3140 = vmatprep.subr.bf16.mxu0 %v3654_v18 }
 0x1fd   : > { %3141 = vmatpush3.bf16.msra.mxu0 %v3348_v41  ;;  %v3398_v41 = vld [vmem:[%s3926_s13 + $0xf8] sm:$0xff]  }
 0x2a0   : > { %v1170_v49 = vpop.f32.mrf.mxu0 }
 0x2a1   : > { %v1171_v55 = vadd.f32 %v1170_v49, %v996_v50 }
 0x2a2   : > { %v1172_v51 = vpop.f32.mrf.mxu0  ;;  %v1211_v58 = vpop.f32.mrf.mxu1 }
 0x2a3   : > { %v1173_v52 = vadd.f32 %v1172_v51, %v1000_v48  ;;  %v1212_v59 = vadd.f32 %v1211_v58, %v1004_v57  ;;  %v3349_v57 = vld [vmem:[%s3971_s1 + $0xe0] ss:$16 sps:$4 sm:$0xff]   ;;  %v3351_v58 = vld [vmem:[%s3971_s1 + $0xe4] ss:$16 sps:$4 sm:$0xff]  }
 0x2a4   : > { %v1174_v54 = vpop.f32.mrf.mxu0  ;;  %v3104_v60 = vpop.f32.mrf.mxu1 }
 0x2a5   : > { %1389 = vrot.lane.b32.xlu1 %v1173_v52, %s3656_s6  ;;  %3107 = vmatpush3.xpose.msk.msra.mxu1 %vm1217_vm1, %v1173_v52  ;;  %v3354_v60 = vld [vmem:[%s3971_s1 + $0xec] ss:$16 sps:$4 sm:$0xff]  }
 0x2a6   : > { %v1175_v56 = vpop.f32.mrf.mxu0  ;;  %3111 = vmatprep.subr.mxu1 %v3654_v18  ;;  %v1214_v61 = vpop.f32.mrf.mxu1  ;;  %1957 = vmatprep.subr.bf16.mxu0 %v3354_v60  ;;  %v3414_v60 = vld [vmem:[%s3926_s13 + $0xd8] sm:$0xff]  }
 0x2a7   : > { %v3360_v61 = vld [vmem:[%s3971_s1 + $0xcc] ss:$16 sps:$4 sm:$0xff]  }
 0x2a8   : > { %3109 = vmatmul.mubr.msk.f32.vlgmr.msra.gmra.mxu1 %vm1217_vm1, %v1171_v55  ;;  %v3105_v62 = vpop.f32.mrf.mxu1 }
 0x2a9   : > { %1387 = vrot.lane.b32.xlu1 %v1171_v55, %s3656_s6  ;;  %3113 = vmatprep.mubr.msk.f32.mxu1 %vm3655_vm0, %v3654_v18  ;;  %v3355_v62 = vld [vmem:[%s3971_s1 + $0xc0] ss:$16 sps:$4 sm:$0xff]  }
 0x2aa   : > { %3112 = vmatpush3.msra.mxu1 %v1212_v59 }
 0x2ab   : > { %3116 = vmatprep.subr.mxu1 %v3654_v18 }
 0x317   : > { %v1390_v12 = vpop.permute.xlu1 %1389 }
 0x31b   : > { %v1388_v14 = vpop.permute.xlu1 %1387 }
 0x368   : > { %v1290_v63 = vpop.f32.mrf.mxu1 }
 0x369   : > { %v1294_v1 = vmul.f32 0.125, %v1290_v63 }
 0x36a   : > { %v3110_v2 = vpop.f32.mrf.mxu1 }
 0x36b   : > { %v1301_v3 = vadd.f32 %v2893_v0, %v1294_v1 }
 0x36d   : > { %v1303_v4 = vsel %vm1302_vm2, %v1301_v3, -inf }
 0x36e   : > { %1304 = vmax.xlane.f32.xlu0 %v1303_v4  ;;  %v3366_v4 = vld [vmem:[%s3971_s1 + $0xac] ss:$16 sps:$4 sm:$0xff]  }
 0x3f7   : > { %v1305_v5 = vpop.xlane.xlu0 %1304 }
 0x3f8   : > { %v1306_v6 = vsub.f32 %v1301_v3, %v1305_v5  ;;  %v3363_v3 = vld [vmem:[%s3971_s1 + $0xa4] ss:$16 sps:$4 sm:$0xff]   ;;  %v3361_v5 = vld [vmem:[%s3971_s1 + $0xa0] ss:$16 sps:$4 sm:$0xff]  }
 0x3fa   : > { %v1307_v7 = vmul.f32 1.442695, %v1306_v6  ;;  %v3364_v6 = vld [vmem:[%s3971_s1 + $0xa8] ss:$16 sps:$4 sm:$0xff]  }
 0x3fc   : > { %3429 = vpow2.f32 %v1307_v7  ;;  %v3367_v7 = vld [vmem:[%s3971_s1 + $0x80] ss:$16 sps:$4 sm:$0xff]  }
 0x409   : > { %v3430_v8 = vpop.eup %3429 }
 0x40a   : > { %v1309_v9 = vsel %vm1302_vm2, %v3430_v8, 0.0 }
 0x40b   : > { %1310 = vadd.xlane.f32.xlu0 %v1309_v9  ;;  %v3370_v9 = vld [vmem:[%s3971_s1 + $0x88] ss:$16 sps:$4 sm:$0xff]  }
 0x494   : > { %v1311_v10 = vpop.xlane.xlu0 %1310 }
 0x495   : > { %3431 = vrcp.f32 %v1311_v10  ;;  %v3372_v10 = vld [vmem:[%s3971_s1 + $0x8c] ss:$16 sps:$4 sm:$0xff]  }
 0x4a2   : > { %v3432_v11 = vpop.eup %3431 }
 0x4a3   : > { %v1313_v13 = vmul.f32 %v3432_v11, %v3430_v8  ;;  %v3369_v8 = vld [vmem:[%s3971_s1 + $0x84] ss:$16 sps:$4 sm:$0xff]  }
 0x4a4   : > { %v3375_v11 = vld [vmem:[%s3971_s1 + $0x64] ss:$16 sps:$4 sm:$0xff]  }
 0x4a5   : > { %3114 = vmatmul.mubr.msk.f32.vlgmr.msra.gmra.mxu1 %vm1302_vm2, %v1313_v13  ;;  %v3373_v13 = vld [vmem:[%s3971_s1 + $0x60] ss:$16 sps:$4 sm:$0xff]  }
 0x4a6   : > { %3117 = vmatpush3.xpose.msk.msra.mxu1 %vm1217_vm1, %v1390_v12  ;;  %3118 = vmatprep.mubr.msk.f32.mxu1 %vm3655_vm0, %v3654_v18  ;;  %v3378_v12 = vld [vmem:[%s3971_s1 + $0x6c] ss:$16 sps:$4 sm:$0xff]  }
 0x4a7   : > { %3121 = vmatprep.subr.mxu1 %v3654_v18 }
 0x4a9   : > { %3119 = vmatmul.mubr.msk.f32.vlgmr.msra.gmra.mxu1 %vm1217_vm1, %v1388_v14  ;;  %v3376_v14 = vld [vmem:[%s3971_s1 + $0x68] ss:$16 sps:$4 sm:$0xff]  }
 0x4aa   : > { %3123 = vmatprep.mubr.msk.f32.mxu1 %vm3655_vm0, %v3654_v18  ;;  %v2898_v18 = vld [vmem:[%s4407_s18] ss:$0 sm:$0xff] }
 0x565   : > { %v1383_v15 = vpop.f32.mrf.mxu1 }
 0x567   : > { %v3115_v16 = vpop.f32.mrf.mxu1 }
 0x568   : > { %v3384_v16 = vld [vmem:[%s3971_s1 + $0x4c] ss:$16 sps:$4 sm:$0xff]  }
 0x569   : > { %v1461_v19 = vpop.f32.mrf.mxu1 }
 0x56a   : > { %v1465_v20 = vmul.f32 0.125, %v1461_v19  ;;  %v3379_v19 = vld [vmem:[%s3971_s1 + $0x40] ss:$16 sps:$4 sm:$0xff]  }
 0x56b   : > { %v3120_v21 = vpop.f32.mrf.mxu1 }
 0x56c   : > { %v1466_v22 = vadd.f32 %v2893_v0, %v1465_v20  ;;  %v3382_v20 = vld [vmem:[%s3971_s1 + $0x48] ss:$16 sps:$4 sm:$0xff]   ;;  %v3387_v21 = vld [vmem:[%s3971_s1 + $0x24] ss:$16 sps:$4 sm:$0xff]  }
 0x56e   : > { %v1467_v23 = vsel %vm1302_vm2, %v1466_v22, -inf }
 0x56f   : > { %1468 = vmax.xlane.f32.xlu0 %v1467_v23  ;;  %v3385_v23 = vld [vmem:[%s3971_s1 + $0x20] ss:$16 sps:$4 sm:$0xff]  }
 0x585   : > { %1479 = vrot.lane.b32.xlu0 %v1212_v59, %s3656_s6  ;;  %v3352_v59 = vld [vmem:[%s3971_s1 + $0xe8] ss:$16 sps:$4 sm:$0xff]  }
 0x5f8   : > { %v1469_v24 = vpop.xlane.xlu0 %1468 }
 0x5f9   : > { %v1470_v25 = vsub.f32 %v1466_v22, %v1469_v24  ;;  %v3390_v22 = vld [vmem:[%s3971_s1 + $0x2c] ss:$16 sps:$4 sm:$0xff]   ;;  %v3388_v24 = vld [vmem:[%s3971_s1 + $0x28] ss:$16 sps:$4 sm:$0xff]  }
 0x5fb   : > { %v1471_v26 = vmul.f32 1.442695, %v1470_v25  ;;  %v3393_v25 = vld [vmem:[%s3971_s1 + $0x4] ss:$16 sps:$4 sm:$0xff]  }
 0x5fc   : > { %v1480_v27 = vpop.permute.xlu0 %1479 }
 0x5fd   : > { %3433 = vpow2.f32 %v1471_v26  ;;  %3122 = vmatpush3.msra.mxu1 %v1480_v27  ;;  %v3396_v26 = vld [vmem:[%s3971_s1 + $0xc] ss:$16 sps:$4 sm:$0xff]   ;;  %v3391_v27 = vld [vmem:[%s3971_s1] ss:$16 sps:$4 sm:$0xff]  }
 0x5fe   : > { %1916 = vmatprep.subr.bf16.mxu1 %v3351_v58  ;;  %v3412_v58 = vld [vmem:[%s3926_s13 + $0xa0] sm:$0xff]  }
 0x60a   : > { %v3434_v28 = vpop.eup %3433 }
 0x60b   : > { %v1473_v29 = vsel %vm1302_vm2, %v3434_v28, 0.0 }
 0x60c   : > { %1474 = vadd.xlane.f32.xlu1 %v1473_v29 }
 0x695   : > { %v1475_v30 = vpop.xlane.xlu1 %1474 }
 0x696   : > { %3435 = vrcp.f32 %v1475_v30 }
 0x6a3   : > { %v3436_v31 = vpop.eup %3435 }
 0x6a4   : > { %v1477_v32 = vmul.f32 %v3436_v31, %v3434_v28  ;;  %v3394_v28 = vld [vmem:[%s3971_s1 + $0x8] ss:$16 sps:$4 sm:$0xff]  }
 0x6a6   : > { %3124 = vmatmul.mubr.msk.f32.vlgmr.msra.gmra.mxu1 %vm1302_vm2, %v1477_v32 }
 0x6a7   : > { %1948 = vmatprep.mubr.bf16.mxu1 %v3653_v17  ;;  %1917 = vmatpush1.bf16.msra.mxu1 %v3349_v57  ;;  %v3411_v57 = vld [vmem:[%s3926_s13 + $0x20] sm:$0xff]  }
 0x766   : > { %v1551_v42 = vpop.f32.mrf.mxu1 }
 0x767   : > { %1556 = vrot.lane.b32.xlu0 %v1551_v42, %s3656_s6  ;;  %v3399_v42 = vld [vmem:[%s3926_s13 + $0x38] sm:$0xff]  }
 0x768   : > { %v3125_v43 = vpop.f32.mrf.mxu1 }
 0x769   : > { %v3400_v43 = vld [vmem:[%s3926_s13 + $0xb8] sm:$0xff]  }
 0x7d9   : > { %v1557_v46 = vpop.permute.xlu0 %1556 }
 0x7da   : > { %v1559_v48 = vsel %vm1217_vm1, %v1383_v15, %v1557_v46  ;;  %v3381_v15 = vld [vmem:[%s3971_s1 + $0x44] ss:$16 sps:$4 sm:$0xff]   ;;  %v3401_v46 = vld [vmem:[%s3926_s13 + $0x70] sm:$0xff]  }
 0x7db   : > { %v1560_v49 = vpack.c.bf16 %v1559_v48, %v1559_v48  ;;  %v3402_v48 = vld [vmem:[%s3926_s13 + $0xf0] sm:$0xff]  }
 0x7dd   : > { %3143 = vmatmul.mubr.bf16.vlgmr.msra.gmra.mxu0 %v1560_v49  ;;  %v3403_v49 = vld [vmem:[%s3926_s13 + $0x30] sm:$0xff]  }
 0x7de   : > { %1989 = vmatprep.mubr.bf16.mxu0 %v3653_v17  ;;  %v3357_v17 = vld [vmem:[%s3971_s1 + $0xc4] ss:$16 sps:$4 sm:$0xff]   ;;  %1958 = vmatpush1.bf16.msra.mxu0 %v3352_v59 }
 0x7df   : > { %1918 = vmatprep.subr.bf16.mxu1 %v3357_v17  ;;  %1959 = vmatprep.subr.bf16.mxu0 %v3360_v61  ;;  %v3413_v59 = vld [vmem:[%s3926_s13 + $0x58] sm:$0xff]  }
 0x7e0   : > { %1919 = vmatpush1.bf16.msra.mxu1 %v3355_v62  ;;  %v3415_v17 = vld [vmem:[%s3926_s13 + $0x18] sm:$0xff]   ;;  %v3417_v62 = vld [vmem:[%s3926_s13 + $0x50] sm:$0xff]  }
 0x7e1   : > { %1920 = vmatprep.subr.bf16.mxu1 %v3363_v3  ;;  %v3416_v61 = vld [vmem:[%s3926_s13 + $0x98] sm:$0xff]   ;;  %v3423_v3 = vld [vmem:[%s3926_s13 + $0x8] sm:$0xff]  }
 0x7e4   : > { %1921 = vmatpush1.bf16.msra.mxu1 %v3361_v5  ;;  %v3425_v5 = vld [vmem:[%s3926_s13 + $0x40] sm:$0xff]  }
 0x7e5   : > { %1922 = vmatprep.subr.bf16.mxu1 %v3369_v8  ;;  %v3428_v8 = vld [vmem:[%s3926_s13 + $0x80] sm:$0xff]  }
 0x7e8   : > { %1923 = vmatpush1.bf16.msra.mxu1 %v3367_v7  ;;  %v3427_v7 = vld [vmem:[%s3926_s13] sm:$0xff]  }
 0x7e9   : > { %1924 = vmatprep.subr.bf16.mxu1 %v3375_v11 }
 0x7ec   : > { %1925 = vmatpush1.bf16.msra.mxu1 %v3373_v13 }
 0x7ed   : > { %1926 = vmatprep.subr.bf16.mxu1 %v3381_v15 }
 0x7f0   : > { %1927 = vmatpush1.bf16.msra.mxu1 %v3379_v19 }
 0x7f1   : > { %1928 = vmatprep.subr.bf16.mxu1 %v3387_v21 }
 0x7f4   : > { %1929 = vmatpush1.bf16.msra.mxu1 %v3385_v23 }
 0x7f5   : > { %1930 = vmatprep.subr.bf16.mxu1 %v3393_v25 }
 0x7f8   : > { %1931 = vmatpush1.bf16.msra.mxu1 %v3391_v27 }
 0x7f9   : > { %3016 = vmatprep.subr.bf16.mxu1 %v3397_v40 }
 0x89d   : > { %v1666_v50 = vpop.f32.mrf.mxu0 }
 0x89e   : > { %v1667_v51 = vadd.f32 %v2898_v18, %v1666_v50  ;;  %v3404_v18 = vld [vmem:[%s3926_s13 + $0xb0] sm:$0xff]   ;;  %v3405_v50 = vld [vmem:[%s3926_s13 + $0x68] sm:$0xff]  }
 0x89f   : > { %v3144_v52 = vpop.f32.mrf.mxu0 }
 0x8a0   : > { %v1672_v54 = vadd.f32 %v1667_v51, %v4029_v38  ;;  %v3358_v38 = vld [vmem:[%s3971_s1 + $0xc8] ss:$16 sps:$4 sm:$0xff]  }
 0x8a1   : > { %v1669_v55 = vpop.f32.mrf.mxu0  ;;  %1960 = vmatpush1.bf16.msra.mxu0 %v3358_v38  ;;  %v3406_v51 = vld [vmem:[%s3926_s13 + $0xe8] sm:$0xff]   ;;  %v3418_v38 = vld [vmem:[%s3926_s13 + $0xd0] sm:$0xff]  }
 0x8a2   : > { %1675 = vadd.xlane.f32.xlu0 %v1672_v54  ;;  %1961 = vmatprep.subr.bf16.mxu0 %v3366_v4  ;;  %v3407_v52 = vld [vmem:[%s3926_s13 + $0x28] sm:$0xff]   ;;  %v3409_v55 = vld [vmem:[%s3926_s13 + $0x60] sm:$0xff]  }
 0x8a3   : > { %v3145_v56 = vpop.f32.mrf.mxu0  ;;  %v3424_v4 = vld [vmem:[%s3926_s13 + $0x88] sm:$0xff]  }
 0x8a4   : > { %v3410_v56 = vld [vmem:[%s3926_s13 + $0xe0] sm:$0xff]  }
 0x8a5   : > { %1962 = vmatpush1.bf16.msra.mxu0 %v3364_v6  ;;  %v3426_v6 = vld [vmem:[%s3926_s13 + $0xc0] sm:$0xff]  }
 0x8a6   : > { %1963 = vmatprep.subr.bf16.mxu0 %v3372_v10  ;;  %v1750_v10 = vsub.s32 3, %v4046_v44 }
 0x8a9   : > { %1964 = vmatpush1.bf16.msra.mxu0 %v3370_v9  ;;  %v1734_v9 = vld [vmem:[%s3976_s22] sm:$0xf] }
 0x8aa   : > { %1965 = vmatprep.subr.bf16.mxu0 %v3378_v12  ;;  %v1739_v11 = vrot.slane %v1734_v9, %v995_v47  ;;  %v1747_v12 = vrot.slane %v1734_v9, %v1003_v53  ;;  %v1743_v13 = vrot.slane %v1734_v9, %v999_v45 }
 0x8ad   : > { %1966 = vmatpush1.bf16.msra.mxu0 %v3376_v14  ;;  %v1751_v14 = vrot.slane %v1734_v9, %v1750_v10 }
 0x8ae   : > { %1967 = vmatprep.subr.bf16.mxu0 %v3384_v16 }
 0x8b1   : > { %1968 = vmatpush1.bf16.msra.mxu0 %v3382_v20 }
 0x8b2   : > { %1969 = vmatprep.subr.bf16.mxu0 %v3390_v22 }
 0x8b5   : > { %1970 = vmatpush1.bf16.msra.mxu0 %v3388_v24 }
 0x8b6   : > { %1971 = vmatprep.subr.bf16.mxu0 %v3396_v26 }
 0x8b9   : > { %1972 = vmatpush1.bf16.msra.mxu0 %v3394_v28 }
 0x8ba   : > { %3038 = vmatprep.subr.bf16.mxu0 %v3398_v41 }
 0x92b   : > { %v1676_v63 = vpop.xlane.xlu0 %1675 }
 0x92c   : > { %v1678_v0 = vmul.f32 0.0078125, %v1676_v63  ;;  %v3419_v63 = vld [vmem:[%s3926_s13 + $0x10] sm:$0xff]  }
 0x92e   : > { %v1679_v1 = vsub.f32 %v1672_v54, %v1678_v0  ;;  %v3408_v54 = vld [vmem:[%s3926_s13 + $0xa8] sm:$0xff]   ;;  %v3420_v0 = vld [vmem:[%s3926_s13 + $0x90] sm:$0xff]  }
 0x930   : > { %v1680_v2 = vmul.f32 %v1679_v1, %v1679_v1 }
 0x932   : > { %1681 = vadd.xlane.f32.xlu1 %v1680_v2  ;;  %v3422_v2 = vld [vmem:[%s3926_s13 + $0xc8] sm:$0xff]  }
 0x9bb   : > { %v1682_v29 = vpop.xlane.xlu1 %1681 }
 0x9bc   : > { %v1683_v30 = vmul.f32 0.0078125, %v1682_v29 }
 0x9be   : > { %v1684_v31 = vadd.f32 1e-05, %v1683_v30 }
 0x9c0   : > { %3437 = vrsqrt.f32 %v1684_v31 }
 0x9cd   : > { %v3438_v32 = vpop.eup %3437 }
 0x9ce   : > { %v1686_v34 = vmul.f32 %v3438_v32, %v1679_v1  ;;  %v3421_v1 = vld [vmem:[%s3926_s13 + $0x48] sm:$0xff]  }
 0x9d0   : > { %v1693_v36 = vmul.f32 %v2907_v33, %v1686_v34 }
 0x9d2   : > { %v4152_v37 = vadd.f32 %v2908_v35, %v1693_v36 }
 0x9d4   : > { %v1701_v39 = vpack.c.bf16 %v4152_v37, %v4152_v37 }
 0x9d6   : > { %1949 = vmatmul.mubr.bf16.vlgmr.msra.gmra.mxu1 %v1701_v39  ;;  %1990 = vmatmul.mubr.bf16.vlgmr.msra.gmra.mxu0 %v1701_v39 }
 0x9d7   : > { %3017 = vmatpush3.bf16.msra.mxu1 %v3399_v42  ;;  %3039 = vmatpush3.bf16.msra.mxu0 %v3400_v43 }
 0x9d8   : > { %3018 = vmatprep.subr.bf16.mxu1 %v3401_v46  ;;  %3040 = vmatprep.subr.bf16.mxu0 %v3402_v48 }
 0x9db   : > { %3019 = vmatpush3.bf16.msra.mxu1 %v3403_v49  ;;  %3041 = vmatpush3.bf16.msra.mxu0 %v3404_v18 }
 0x9dc   : > { %3020 = vmatprep.subr.bf16.mxu1 %v3405_v50  ;;  %3042 = vmatprep.subr.bf16.mxu0 %v3406_v51 }
 0x9df   : > { %3021 = vmatpush3.bf16.msra.mxu1 %v3407_v52  ;;  %3043 = vmatpush3.bf16.msra.mxu0 %v3408_v54 }
 0x9e0   : > { %3022 = vmatprep.subr.bf16.mxu1 %v3409_v55  ;;  %3044 = vmatprep.subr.bf16.mxu0 %v3410_v56 }
 0x9e3   : > { %3023 = vmatpush3.bf16.msra.mxu1 %v3411_v57  ;;  %3045 = vmatpush3.bf16.msra.mxu0 %v3412_v58 }
 0x9e4   : > { %3024 = vmatprep.subr.bf16.mxu1 %v3413_v59  ;;  %3046 = vmatprep.subr.bf16.mxu0 %v3414_v60 }
 0x9e7   : > { %3025 = vmatpush3.bf16.msra.mxu1 %v3415_v17  ;;  %3047 = vmatpush3.bf16.msra.mxu0 %v3416_v61 }
 0x9e8   : > { %3026 = vmatprep.subr.bf16.mxu1 %v3417_v62  ;;  %3048 = vmatprep.subr.bf16.mxu0 %v3418_v38 }
 0x9eb   : > { %3027 = vmatpush3.bf16.msra.mxu1 %v3419_v63  ;;  %3049 = vmatpush3.bf16.msra.mxu0 %v3420_v0 }
 0x9ec   : > { %3028 = vmatprep.subr.bf16.mxu1 %v3421_v1  ;;  %3050 = vmatprep.subr.bf16.mxu0 %v3422_v2 }
 0x9ef   : > { %3029 = vmatpush3.bf16.msra.mxu1 %v3423_v3  ;;  %3051 = vmatpush3.bf16.msra.mxu0 %v3424_v4 }
 0x9f0   : > { %3030 = vmatprep.subr.bf16.mxu1 %v3425_v5  ;;  %3052 = vmatprep.subr.bf16.mxu0 %v3426_v6  ;;  %v2941_v6 = vld [vmem:[%s911_s23] ss:$0 sm:$0xff] }
 0x9f3   : > { %3031 = vmatpush3.bf16.msra.mxu1 %v3427_v7  ;;  %3053 = vmatpush3.bf16.msra.mxu0 %v3428_v8 }
 0xa96   : > { %v1950_v15 = vpop.f32.mrf.mxu1  ;;  %v1991_v16 = vpop.f32.mrf.mxu0 }
 0xa97   : > { %v1951_v19 = vadd.f32 %v1950_v15, %v1739_v11  ;;  %v1992_v20 = vadd.f32 %v1991_v16, %v1747_v12 }
 0xa98   : > { %v1952_v21 = vpop.f32.mrf.mxu1  ;;  %v1993_v22 = vpop.f32.mrf.mxu0 }
 0xa99   : > { %v2002_v23 = vmul.f32 0.044715, %v1951_v19  ;;  %v2004_v24 = vmul.f32 0.044715, %v1992_v20  ;;  %v1953_v25 = vadd.f32 %v1952_v21, %v1743_v13  ;;  %v1994_v26 = vadd.f32 %v1993_v22, %v1751_v14 }
 0xa9a   : > { %v1954_v27 = vpop.f32.mrf.mxu1  ;;  %v1995_v28 = vpop.f32.mrf.mxu0  ;;  %v1998_v54 = vmul.f32 0.5, %v1951_v19  ;;  %v2000_v59 = vmul.f32 0.5, %v1992_v20 }
 0xa9b   : > { %v2006_v47 = vmul.f32 %v2002_v23, %v1951_v19  ;;  %v2008_v29 = vmul.f32 %v2004_v24, %v1992_v20  ;;  %v2003_v30 = vmul.f32 0.044715, %v1953_v25  ;;  %v2005_v53 = vmul.f32 0.044715, %v1994_v26  ;;  %v2974_v28 = vld [vmem:[%s914_s27] ss:$0 sm:$0xff] }
 0xa9c   : > { %v1955_v31 = vpop.f32.mrf.mxu1  ;;  %v1996_v44 = vpop.f32.mrf.mxu0  ;;  %v1999_v57 = vmul.f32 0.5, %v1953_v25  ;;  %v2001_v60 = vmul.f32 0.5, %v1994_v26 }
 0xa9d   : > { %v2010_v45 = vmul.f32 %v2006_v47, %v1951_v19  ;;  %v2012_v32 = vmul.f32 %v2008_v29, %v1992_v20  ;;  %v2007_v33 = vmul.f32 %v2003_v30, %v1953_v25  ;;  %v2009_v34 = vmul.f32 %v2005_v53, %v1994_v26 }
 0xa9f   : > { %v2014_v35 = vadd.f32 %v2010_v45, %v1951_v19  ;;  %v2016_v36 = vadd.f32 %v2012_v32, %v1992_v20  ;;  %v2011_v39 = vmul.f32 %v2007_v33, %v1953_v25  ;;  %v2013_v40 = vmul.f32 %v2009_v34, %v1994_v26 }
 0xaa1   : > { %v2018_v41 = vmul.f32 0.7978846, %v2014_v35  ;;  %v2020_v42 = vmul.f32 0.7978846, %v2016_v36  ;;  %v2015_v43 = vadd.f32 %v2011_v39, %v1953_v25  ;;  %v2017_v46 = vadd.f32 %v2013_v40, %v1994_v26 }
 0xaa3   : > { %v2019_v48 = vmul.f32 0.7978846, %v2015_v43  ;;  %v2021_v49 = vmul.f32 0.7978846, %v2017_v46  ;;  %3439 = vtanh.f32 %v2018_v41 }
 0xaa4   : > { %3441 = vtanh.f32 %v2020_v42 }
 0xaa5   : > { %3443 = vtanh.f32 %v2019_v48 }
 0xaa6   : > { %3445 = vtanh.f32 %v2021_v49 }
 0xab0   : > { %v3440_v18 = vpop.eup %3439 }
 0xab1   : > { %v3442_v50 = vpop.eup %3441  ;;  %v2026_v51 = vadd.f32 1.0, %v3440_v18 }
 0xab2   : > { %v3444_v52 = vpop.eup %3443  ;;  %v2028_v55 = vadd.f32 1.0, %v3442_v50 }
 0xab3   : > { %v3446_v56 = vpop.eup %3445  ;;  %v2027_v58 = vadd.f32 1.0, %v3444_v52  ;;  %v2030_v61 = vmul.f32 %v2026_v51, %v1998_v54 }
 0xab4   : > { %v2029_v17 = vadd.f32 1.0, %v3446_v56  ;;  %v2032_v38 = vmul.f32 %v2028_v55, %v2000_v59 }
 0xab5   : > { %v2031_v62 = vmul.f32 %v2027_v58, %v1999_v57  ;;  %v2034_v2 = vpack.c.bf16 %v2030_v61, %v2030_v61 }
 0xab6   : > { %v2033_v63 = vmul.f32 %v2029_v17, %v2001_v60  ;;  %v2036_v3 = vpack.c.bf16 %v2032_v38, %v2032_v38 }
 0xab7   : > { %v2035_v0 = vpack.c.bf16 %v2031_v62, %v2031_v62 }
 0xab8   : > { %v2037_v1 = vpack.c.bf16 %v2033_v63, %v2033_v63 }
 0xab9   : > { %2333 = vmatprep.mubr.bf16.mxu1 %v2035_v0 }
 0xaba   : > { %2373 = vmatprep.mubr.bf16.mxu0 %v2037_v1  ;;  %2334 = vmatmul.mubr.bf16.vlgmr.msra.gmra.mxu1 %v2034_v2 }
 0xabb   : > { %2374 = vmatmul.mubr.bf16.vlgmr.msra.gmra.mxu0 %v2036_v3 }
 0xb7a   : > { %v3032_v4 = vpop.f32.mrf.mxu1 }
 0xb7b   : > { %v3054_v5 = vpop.f32.mrf.mxu0 }
 0xb7c   : > { %v3033_v7 = vpop.f32.mrf.mxu1 }
 0xb7d   : > { %v3034_v8 = vadd.f32 %v3033_v7, %v3032_v4  ;;  %v3055_v9 = vpop.f32.mrf.mxu0 }
 0xb7e   : > { %v3035_v10 = vpop.f32.mrf.mxu1  ;;  %v3056_v12 = vadd.f32 %v3055_v9, %v3054_v5 }
 0xb7f   : > { %v2336_v11 = vadd.f32 %v3034_v8, %v2941_v6  ;;  %v3057_v13 = vpop.f32.mrf.mxu0 }
 0xb80   : > { %v3036_v14 = vpop.f32.mrf.mxu1 }
 0xb81   : > { %v2376_v15 = vadd.f32 %v3056_v12, %v2336_v11  ;;  %v3058_v16 = vpop.f32.mrf.mxu0 }
 0xb83   : > { %v2381_v19 = vadd.f32 %v2376_v15, %v4152_v37  ;;  %v2975_v37 = vld [vmem:[%s917_s8] ss:$0 sm:$0xff] }
 0xb85   : > { %2384 = vadd.xlane.f32.xlu1 %v2381_v19 }
 0xc0e   : > { %v2385_v20 = vpop.xlane.xlu1 %2384 }
 0xc0f   : > { %v2386_v21 = vmul.f32 0.0078125, %v2385_v20 }
 0xc11   : > { %v2387_v22 = vsub.f32 %v2381_v19, %v2386_v21 }
 0xc13   : > { %v2388_v23 = vmul.f32 %v2387_v22, %v2387_v22 }
 0xc15   : > { %2389 = vadd.xlane.f32.xlu1 %v2388_v23 }
 0xc9e   : > { %v2390_v24 = vpop.xlane.xlu1 %2389 }
 0xc9f   : > { %v2391_v25 = vmul.f32 0.0078125, %v2390_v24 }
 0xca1   : > { %v2392_v26 = vadd.f32 1e-05, %v2391_v25 }
 0xca3   : > { %3447 = vrsqrt.f32 %v2392_v26 }
 0xcb0   : > { %v3448_v27 = vpop.eup %3447 }
 0xcb1   : > { %v2394_v47 = vmul.f32 %v3448_v27, %v2387_v22 }
 0xcb3   : > { %v2401_v29 = vmul.f32 %v2974_v28, %v2394_v47  ;;  %2413 = sbr.rel (%p2976_p6) target bundleno = 3694 (0xe6e), region = 124 }
 0xcb5   : > { %v2408_v30 = vadd.f32 %v2975_v37, %v2401_v29 }
 0xcb7   : > { %2409 = vst [vmem:[#allocation2] sm:$0xff] %v2408_v30 }
 0xcb8   : > { %v3449_v53 = vld [vmem:[#allocation9 + $0x38] sm:$0xff]   ;;  %v3657_v31 = vmov 0.0   ;;  %v3450_v44 = vld [vmem:[#allocation9 + $0x30] sm:$0xff]   ;;  %vm3658_vm3 = vmmov 0   ;;  %v3451_v45 = vld [vmem:[#allocation9 + $0x28] sm:$0xff]   ;;  %v2414_v49 = vpack.c.bf16 %v2408_v30, %v2408_v30  ;;  %vm2608_vm4 = vcmask 0  }
 0xcb9   : > { %3146 = vmatprep.subr.bf16.mxu0 %v3657_v31  ;;  %3166 = vmatprep.subr.mxu1 %v3657_v31  ;;  %v2536_v32 = vld [vmem:[%s4415_s20 + $0x78] sm:$0xff]  ;;  %v2535_v33 = vld [vmem:[%s4415_s20 + $0x70] sm:$0xff]  ;;  %v2534_v35 = vld [vmem:[%s4415_s20 + $0x68] sm:$0xff] }
 0xcba   : > { %3147 = vmatpush3.bf16.msra.mxu0 %v3449_v53  ;;  %3162 = vmatprep.mubr.msk.bf16.mxu0 %vm3658_vm3, %v3657_v31  ;;  %v3452_v34 = vld [vmem:[#allocation9 + $0x20] sm:$0xff]   ;;  %v2533_v36 = vld [vmem:[%s4415_s20 + $0x60] sm:$0xff]  ;;  %v2532_v40 = vld [vmem:[%s4415_s20 + $0x58] sm:$0xff] }
 0xcbb   : > { %3148 = vmatprep.subr.bf16.mxu0 %v3657_v31  ;;  %3198 = vmatprep.mubr.msk.f32.mxu1 %vm3658_vm3, %v3657_v31  ;;  %v3453_v39 = vld [vmem:[#allocation9 + $0x18] sm:$0xff]   ;;  %v2531_v41 = vld [vmem:[%s4415_s20 + $0x50] sm:$0xff]  ;;  %v3454_v42 = vld [vmem:[#allocation9 + $0x10] sm:$0xff]  }
 0xcbc   : > { %3167 = vmatpush3.msra.mxu1 %v2536_v32  ;;  %v2530_v43 = vld [vmem:[%s4415_s20 + $0x48] sm:$0xff]  ;;  %v3455_v46 = vld [vmem:[#allocation9 + $0x8] sm:$0xff]   ;;  %v2529_v18 = vld [vmem:[%s4415_s20 + $0x40] sm:$0xff] }
 0xcbd   : > { %3168 = vmatprep.subr.mxu1 %v3657_v31  ;;  %v3456_v48 = vld [vmem:[#allocation9] sm:$0xff]   ;;  %v2528_v50 = vld [vmem:[%s4415_s20 + $0x38] sm:$0xff]  ;;  %v2525_v54 = vld [vmem:[%s4415_s20 + $0x20] sm:$0xff] }
 0xcbe   : > { %3149 = vmatpush3.bf16.msra.mxu0 %v3450_v44  ;;  %3169 = vmatpush3.msra.mxu1 %v2535_v33  ;;  %v2527_v51 = vld [vmem:[%s4415_s20 + $0x30] sm:$0xff]  ;;  %v2526_v52 = vld [vmem:[%s4415_s20 + $0x28] sm:$0xff]  ;;  %v2524_v55 = vld [vmem:[%s4415_s20 + $0x18] sm:$0xff] }
 0xcbf   : > { %3150 = vmatprep.subr.bf16.mxu0 %v3657_v31  ;;  %3170 = vmatprep.subr.mxu1 %v3657_v31  ;;  %v2523_v56 = vld [vmem:[%s4415_s20 + $0x10] sm:$0xff]  ;;  %v2522_v57 = vld [vmem:[%s4415_s20 + $0x8] sm:$0xff]  ;;  %v2521_v58 = vld [vmem:[%s4415_s20] sm:$0xff] }
 0xcc0   : > { %3171 = vmatpush3.msra.mxu1 %v2534_v35  ;;  %v2431_v59 = vld [vmem:[%s4416_s16] sm:$0x1]  ;;  %v2537_v0 = vld [vmem:[#allocation3] sm:$0x1] }
 0xcc1   : > { %3172 = vmatprep.subr.mxu1 %v3657_v31 }
 0xcc2   : > { %3151 = vmatpush3.bf16.msra.mxu0 %v3451_v45  ;;  %3173 = vmatpush3.msra.mxu1 %v2533_v36 }
 0xcc3   : > { %3152 = vmatprep.subr.bf16.mxu0 %v3657_v31  ;;  %3174 = vmatprep.subr.mxu1 %v3657_v31 }
 0xcc4   : > { %3175 = vmatpush3.msra.mxu1 %v2532_v40 }
 0xcc5   : > { %3176 = vmatprep.subr.mxu1 %v3657_v31 }
 0xcc6   : > { %3153 = vmatpush3.bf16.msra.mxu0 %v3452_v34  ;;  %3177 = vmatpush3.msra.mxu1 %v2531_v41 }
 0xcc7   : > { %3154 = vmatprep.subr.bf16.mxu0 %v3657_v31  ;;  %3178 = vmatprep.subr.mxu1 %v3657_v31 }
 0xcc8   : > { %3179 = vmatpush3.msra.mxu1 %v2530_v43 }
 0xcc9   : > { %3180 = vmatprep.subr.mxu1 %v3657_v31 }
 0xcca   : > { %3155 = vmatpush3.bf16.msra.mxu0 %v3453_v39  ;;  %3181 = vmatpush3.msra.mxu1 %v2529_v18 }
 0xccb   : > { %3156 = vmatprep.subr.bf16.mxu0 %v3657_v31  ;;  %3182 = vmatprep.subr.mxu1 %v3657_v31 }
 0xccc   : > { %3183 = vmatpush3.msra.mxu1 %v2528_v50 }
 0xccd   : > { %3184 = vmatprep.subr.mxu1 %v3657_v31 }
 0xcce   : > { %3157 = vmatpush3.bf16.msra.mxu0 %v3454_v42  ;;  %3185 = vmatpush3.msra.mxu1 %v2527_v51 }
 0xccf   : > { %3158 = vmatprep.subr.bf16.mxu0 %v3657_v31  ;;  %3186 = vmatprep.subr.mxu1 %v3657_v31 }
 0xcd0   : > { %3187 = vmatpush3.msra.mxu1 %v2526_v52 }
 0xcd1   : > { %3188 = vmatprep.subr.mxu1 %v3657_v31 }
 0xcd2   : > { %3159 = vmatpush3.bf16.msra.mxu0 %v3455_v46  ;;  %3189 = vmatpush3.msra.mxu1 %v2525_v54 }
 0xcd3   : > { %3160 = vmatprep.subr.bf16.mxu0 %v3657_v31  ;;  %3190 = vmatprep.subr.mxu1 %v3657_v31 }
 0xcd4   : > { %3191 = vmatpush3.msra.mxu1 %v2524_v55 }
 0xcd5   : > { %3192 = vmatprep.subr.mxu1 %v3657_v31 }
 0xcd6   : > { %3161 = vmatpush3.bf16.msra.mxu0 %v3456_v48  ;;  %3193 = vmatpush3.msra.mxu1 %v2523_v56 }
 0xcd7   : > { %3194 = vmatprep.subr.mxu1 %v3657_v31 }
 0xcd8   : > { %3195 = vmatpush3.msra.mxu1 %v2522_v57 }
 0xcd9   : > { %3163 = vmatmul.mubr.bf16.vlgmr.msra.gmra.mxu0 %v2414_v49  ;;  %3196 = vmatprep.subr.mxu1 %v3657_v31 }
 0xcda   : > { %3197 = vmatpush3.msra.mxu1 %v2521_v58 }
 0xd99   : > { %v2514_v60 = vpop.f32.mrf.mxu0 }
 0xd9a   : > { %v2515_v17 = vadd.f32 %v2514_v60, %v2431_v59 }
 0xd9b   : > { %v3164_v61 = vpop.f32.mrf.mxu0 }
 0xd9c   : > { %3457 = vtanh.f32 %v2515_v17 }
 0xd9d   : > { %v2517_v62 = vpop.f32.mrf.mxu0 }
 0xd9f   : > { %v3165_v38 = vpop.f32.mrf.mxu0 }
 0xda9   : > { %v3458_v63 = vpop.eup %3457 }
 0xdaa   : > { %3199 = vmatmul.mubr.f32.vlgmr.msra.gmra.mxu1 %v3458_v63 }
 0xe6a   : > { %v2604_v1 = vpop.f32.mrf.mxu1 }
 0xe6b   : > { %v2605_v2 = vadd.f32 %v2604_v1, %v2537_v0 }
 0xe6c   : > { %v3200_v3 = vpop.f32.mrf.mxu1 }
 0xe6d   : > { %2609 = vst.msk [vmem:[%s920_s10] sm:$0x1] %vm2608_vm4, %v2605_v2 }
 0xe6e PF: > { %s4418_s21 = sld [smem:[#allocation18_spill]] }
 0xe6f   : > { %s4419_s23 = sld [smem:[#allocation14_spill]] }
 0xe70   : > { %s4420_s24 = sld [smem:[#allocation15_spill]] }
 0xe71   : > { %s4421_s2 = sld [smem:[#allocation21_spill]] }
 0xe72   : > { %s4422_s25 = sld [smem:[#allocation16_spill]] }
 0xe73   : > { %s4423_s3 = sld [smem:[#allocation17_spill]] }
 0xe74   : > { %s39_s19 = sadd.s32 1, %s4418_s21   ;;  %s4424_s26 = sld [smem:[#allocation19_spill]] }
 0xe75   : > { %p36_p2 = scmp.ge.s32.totalorder %s39_s19, 6   ;;  %s4425_s27 = sld [smem:[#allocation20_spill]] }
 0xe77   :  { %38 = sbr.rel (!%p36_p2) target bundleno = 28 (0x1c), region = 209 }
 0xe7c   :  { %2627 = vsyncpa [#allocation5], 1 }
 0xe7d   :  { %2629 = vsyncpa [#allocation5 + $0x1], 1 }
 0xe7e   :  { %2630 = vsyncpa [#allocation7], 1 }
 0xe7f   :  { %2632 = vsyncpa [#allocation7 + $0x1], 1 }
 0xe80   :  { %2633 = vsyncpa [#allocation10], 1 }

</bundles_post_ra>
